<compile_context>
chip_gen: v5e
topology: v5e:2x2
jax: 0.10.0
libtpu: 0.0.40
codegen_flags: <defaults>
</compile_context>

<pallas_src>
import functools

import jax
import jax.numpy as jnp
from jax import lax
from jax.experimental import pallas as pl
from jax.experimental.pallas import tpu as pltpu

_LANE = 128  # lane width (last dim); also used for the row/contraction pad


def _round_up(v, m):
    return (v + m - 1) // m * m


# ---------------------------------------------------------------------------
# Kernels
# ---------------------------------------------------------------------------
def _order_loop(x_ref, adj_n, out_ref, order):
    """h = adj_n @ h + x, `order` times; bf16 MXU operands, f32 accumulation."""
    x = x_ref[...].astype(jnp.float32)

    def step(h):
        return jnp.dot(adj_n, h.astype(jnp.bfloat16),
                       preferred_element_type=jnp.float32) + x

    if order <= 4:  # static python int -> unrolled (order is small in practice)
        h = x
        for _ in range(order):
            h = step(h)
    else:  # bound code size / vreg live ranges for large order
        h = lax.fori_loop(0, order, lambda _, h: step(h), x)

    out_ref[...] = h.astype(out_ref.dtype)


def _ge_kernel_normalize(x_ref, adj_ref, out_ref, adj_n_ref, *, order):
    """In-kernel row-L2 normalize (once, at grid step 0) -> bf16 scratch,
    then the order loop against the resident bf16 adjacency."""
    @pl.when(pl.program_id(0) == 0)
    def _():
        adj = adj_ref[...].astype(jnp.float32)
        # F.normalize(adj, p=2, dim=1) == adj / max(||row||_2, 1e-12)
        # rsqrt-multiply (EUP slot) instead of a divide; eps on the squared norm.
        row_sq = jnp.sum(adj * adj, axis=1, keepdims=True)
        inv_norm = lax.rsqrt(jnp.maximum(row_sq, jnp.float32(1e-24)))
        adj_n_ref[...] = (adj * inv_norm).astype(jnp.bfloat16)

    _order_loop(x_ref, adj_n_ref[...], out_ref, order)


def _ge_kernel_prenormalized(x_ref, adj_ref, out_ref, *, order):
    """adj is already row-normalized and bf16 (cast in the wrapper)."""
    _order_loop(x_ref, adj_ref[...], out_ref, order)


# ---------------------------------------------------------------------------
# Wrapper
# ---------------------------------------------------------------------------
def graph_encoder_forward(x, adj, *, order: int, adj_is_normalized: bool = False):
    """x: [N, D] float32, adj: [N, N].  Returns [N, D] float32."""
    n, d = x.shape
    assert adj.shape == (n, n)

    n_pad = max(_round_up(n, _LANE), _LANE)   # lane + contraction alignment
    d_pad = max(_round_up(d, _LANE), _LANE)   # lane-dense output stores

    # Feature-axis tile: adj stays resident, x/h/out are split into column
    # slabs (on v7x the two TensorCores each take half the columns when the
    # pre-normalized "parallel" path is used).
    if d_pad <= 256:
        td = d_pad
    elif d_pad % 256 == 0:
        td = 256
    else:
        td = 128
    grid = (d_pad // td,)

    # Zero padding is exact: padded adj rows/cols are zero (and remain zero
    # after row normalization), padded x rows/cols stay zero every iteration.
    x_p = x if (n_pad == n and d_pad == d) else jnp.pad(
        x, ((0, n_pad - n), (0, d_pad - d)))
    # TODO(synk): for unaligned N, fold this pad into a row-tiled
    # pre-normalization kernel instead of materializing a padded adj in HBM.
    adj_p = adj if n_pad == n else jnp.pad(adj, ((0, n_pad - n), (0, n_pad - n)))

    if adj_is_normalized:
        adj_p = adj_p.astype(jnp.bfloat16)     # half the HBM read + VMEM
        kernel = functools.partial(_ge_kernel_prenormalized, order=order)
        scratch_shapes = ()
        semantics = ("parallel",)              # megacore-shardable on v7x
        adj_bytes = n_pad * n_pad * 2
        transcendentals = 0
        norm_extra = 0
    else:
        kernel = functools.partial(_ge_kernel_normalize, order=order)
        scratch_shapes = [pltpu.VMEM((n_pad, n_pad), jnp.bfloat16)]
        semantics = ("arbitrary",)             # step-0 scratch fill must go first
        adj_bytes = n_pad * n_pad * 4
        transcendentals = n_pad
        norm_extra = n_pad * n_pad * 2 + n_pad * n_pad * 4  # bf16 scratch + temps

    # ---- VMEM budget for the resident-adjacency design -------------------
    try:
        vmem_cap = int(pltpu.get_tpu_info().vmem_capacity_bytes)
    except Exception:
        vmem_cap = 64 << 20                    # conservative (v7x per-TC VMEM)
    vmem_cap_usable = int(0.90 * vmem_cap)

    xo_block = n_pad * td * 4
    xo_bufs = 1 if grid[0] == 1 else 2
    need = (adj_bytes                          # adj input block (single buffer)
            + norm_extra                       # bf16 scratch + normalize temps
            + 2 * xo_bufs * xo_block           # x + out pipelined blocks
            + 3 * xo_block                     # live f32 h / accumulators
            + (2 << 20))                       # slack
    if need > vmem_cap_usable:
        # TODO(synk): add a row-tiled (adj block (TM, n_pad)) fallback kernel
        # for graphs whose adjacency does not fit in VMEM.
        raise ValueError(
            f"GraphEncoder Pallas kernel needs ~{need >> 20} MiB VMEM but only "
            f"{vmem_cap_usable >> 20} MiB is usable on this chip; adjacency is "
            "too large for the resident-adj kernel.")
    vmem_limit = int(min(max(need, 32 << 20), vmem_cap_usable))

    cost = pl.CostEstimate(
        flops=2 * order * n_pad * n_pad * d_pad,
        transcendentals=transcendentals,
        bytes_accessed=adj_bytes + 2 * n_pad * d_pad * 4)

    def _specs(use_buffered):
        def bspec(shape, imap, nbuf):
            if use_buffered:
                return pl.BlockSpec(shape, imap, pipeline_mode=pl.Buffered(nbuf))
            return pl.BlockSpec(shape, imap)
        in_specs = [
            bspec((n_pad, td), lambda j: (0, j), xo_bufs),        # x column slab
            bspec((n_pad, n_pad), lambda j: (0, 0), 1),           # adj: resident
        ]
        out_specs = bspec((n_pad, td), lambda j: (0, j), xo_bufs)
        return in_specs, out_specs

    def _call(use_buffered):
        in_specs, out_specs = _specs(use_buffered)
        return pl.pallas_call(
            kernel,
            out_shape=jax.ShapeDtypeStruct((n_pad, d_pad), x.dtype),
            grid=grid,
            in_specs=in_specs,
            out_specs=out_specs,
            scratch_shapes=scratch_shapes,
            compiler_params=pltpu.CompilerParams(
                dimension_semantics=semantics,
                vmem_limit_bytes=vmem_limit),
            cost_estimate=cost,
        )(x_p, adj_p)

    try:
        out_p = _call(use_buffered=True)       # single-buffer one-shot blocks
    except Exception:
        out_p = _call(use_buffered=False)      # fallback: no pipeline_mode

    return out_p[:n, :d]


def precompute_normalized_adj(adj):
    """One-time row-L2 normalization (F.normalize(adj, p=2, dim=1)) cast to
    bf16.  Use with adj_is_normalized=True when the same graph is reused so the
    O(N^2) normalize and half the per-call HBM adj traffic are amortized."""
    adj32 = adj.astype(jnp.float32)
    row_sq = jnp.sum(adj32 * adj32, axis=1, keepdims=True)
    inv = lax.rsqrt(jnp.maximum(row_sq, jnp.float32(1e-24)))
    return (adj32 * inv).astype(jnp.bfloat16)


# ---------------------------------------------------------------------------
# References + (unused) LatentMappingLayer init
# ---------------------------------------------------------------------------
def graph_encoder_ref_f32(x, adj, order):
    """Pure-JAX f32 reference mirroring the PyTorch forward exactly."""
    norm = jnp.sqrt(jnp.sum(adj * adj, axis=1, keepdims=True))
    adj_n = adj / jnp.maximum(norm, 1e-12)
    h = x
    for _ in range(order):
        h = adj_n @ h + x
    return h


def graph_encoder_ref_bf16(x, adj, order):
    """Reference matching the kernel arithmetic (bf16 MXU operands, f32 acc)."""
    row_sq = jnp.sum(adj * adj, axis=1, keepdims=True)
    adj_n = (adj * lax.rsqrt(jnp.maximum(row_sq, 1e-24))).astype(jnp.bfloat16)
    h = x
    for _ in range(order):
        h = jnp.dot(adj_n, h.astype(jnp.bfloat16),
                    preferred_element_type=jnp.float32) + x
    return h


def init_latent_mapping_params(key, input_dim, hidden_dim, output_dim, num_layers=2):
    """Deterministic init of the (unused-in-forward) LatentMappingLayer params,
    matching the nn.Linear shapes built in GraphEncoder.__init__."""
    dims = [input_dim] + [hidden_dim] * (num_layers - 1) + [output_dim]
    params = []
    for i in range(num_layers):
        key, kw, kb = jax.random.split(key, 3)
        bound = 1.0 / (dims[i] ** 0.5)
        w = jax.random.uniform(kw, (dims[i + 1], dims[i]), jnp.float32, -bound, bound)
        b = jax.random.uniform(kb, (dims[i + 1],), jnp.float32, -bound, bound)
        params.append((w, b))
    return params


# ---------------------------------------------------------------------------
# Demo / self-check
# ---------------------------------------------------------------------------
if __name__ == "__main__":
    N, D = 16, 32            # nodes, feature dim
    HIDDEN, OUT = 32, 16     # LatentMappingLayer dims (unused in forward)
    ORDER = 3

    key = jax.random.PRNGKey(0)
    kx, ka, kp = jax.random.split(key, 3)

    x = jax.random.normal(kx, (N, D), dtype=jnp.float32)
    adj = jax.random.uniform(ka, (N, N), dtype=jnp.float32)

    # Initialize module parameters deterministically (not used in forward).
    _latent_params = init_latent_mapping_params(kp, D, HIDDEN, OUT, num_layers=2)

    # Path 1: normalize inside the kernel.
    out = graph_encoder_forward(x, adj, order=ORDER)
    out = jax.block_until_ready(out)
    assert out.shape == (N, D)

    # Tight check vs a reference using the same bf16-MXU arithmetic.
    ref_bf16 = graph_encoder_ref_bf16(x, adj, ORDER)
    assert jnp.allclose(out, ref_bf16, atol=5e-2, rtol=5e-2), "mismatch vs bf16 reference"

    # Looser check vs the exact f32 PyTorch-equivalent math (bf16 drift allowed).
    ref_f32 = graph_encoder_ref_f32(x, adj, ORDER)
    assert jnp.allclose(out, ref_f32, atol=1e-1, rtol=1e-1), "mismatch vs f32 reference"

    # Path 2: pre-normalized bf16 adjacency (graph reused across calls).
    adj_n_bf16 = precompute_normalized_adj(adj)
    out2 = jax.block_until_ready(
        graph_encoder_forward(x, adj_n_bf16, order=ORDER, adj_is_normalized=True))
    assert jnp.allclose(out, out2, atol=5e-2, rtol=5e-2), "prenormalized path mismatch"

    print("KERNEL_OK")
</pallas_src>

<mosaic_0001>
module attributes {stable_mosaic.version = 11 : i64} {
  func.func @_ge_kernel_normalize(%arg0: i32, %arg1: memref<128x128xf32, #tpu.memory_space<vmem>>, %arg2: memref<128x128xf32, #tpu.memory_space<vmem>>, %arg3: memref<128x128xf32, #tpu.memory_space<vmem>>, %arg4: memref<128x128xbf16, #tpu.memory_space<vmem>>) attributes {dimension_semantics = [#tpu.dimension_semantics<arbitrary>], iteration_bounds = array<i64: 1>, scalar_prefetch = 0 : i64, scratch_operands = 1 : i64, tpu.core_type = #tpu.core_type<tc>, window_params = [{pipeline_mode = #tpu.pipeline_mode<synchronous>, transform_indices = @transform_0, window_bounds = array<i64: 128, 128>}, {pipeline_mode = #tpu.pipeline_mode<synchronous>, transform_indices = @transform_1, window_bounds = array<i64: 128, 128>}, {pipeline_mode = #tpu.pipeline_mode<synchronous>, transform_indices = @transform_2, window_bounds = array<i64: 128, 128>}]} {
    %c0_i32 = arith.constant 0 : i32
    %0 = arith.cmpi eq, %arg0, %c0_i32 : i32
    %1 = arith.extui %0 : i1 to i32
    %c0_i32_0 = arith.constant 0 : i32
    %2 = arith.cmpi ne, %1, %c0_i32_0 : i32
    scf.if %2 {
      %c0_8 = arith.constant 0 : index
      %c0_9 = arith.constant 0 : index
      %15 = vector.load %arg2[%c0_8, %c0_9] : memref<128x128xf32, #tpu.memory_space<vmem>>, vector<128x128xf32>
      %16 = arith.mulf %15, %15 : vector<128x128xf32>
      %cst_10 = arith.constant dense<0.000000e+00> : vector<128xf32>
      %17 = vector.multi_reduction <add>, %16, %cst_10 [1] : vector<128x128xf32> to vector<128xf32>
      %18 = vector.shape_cast %17 : vector<128xf32> to vector<128x1xf32>
      %cst_11 = arith.constant 1.000000e-24 : f32
      %19 = vector.broadcast %cst_11 : f32 to vector<128x1xf32>
      %20 = arith.maximumf %18, %19 : vector<128x1xf32>
      %21 = math.rsqrt %20 : vector<128x1xf32>
      %22 = vector.broadcast %21 : vector<128x1xf32> to vector<128x128xf32>
      %23 = arith.mulf %15, %22 : vector<128x128xf32>
      %24 = arith.truncf %23 : vector<128x128xf32> to vector<128x128xbf16>
      %c0_12 = arith.constant 0 : index
      %c0_13 = arith.constant 0 : index
      %25 = vector.load %arg4[%c0_12, %c0_13] : memref<128x128xbf16, #tpu.memory_space<vmem>>, vector<128x128xbf16>
      tpu.vector_store %arg4[%c0_12, %c0_13], %24 {strides = array<i32>} : memref<128x128xbf16, #tpu.memory_space<vmem>>, vector<128x128xbf16>,
    } else {
    }
    %c0 = arith.constant 0 : index
    %c0_1 = arith.constant 0 : index
    %3 = vector.load %arg4[%c0, %c0_1] : memref<128x128xbf16, #tpu.memory_space<vmem>>, vector<128x128xbf16>
    %c0_2 = arith.constant 0 : index
    %c0_3 = arith.constant 0 : index
    %4 = vector.load %arg1[%c0_2, %c0_3] : memref<128x128xf32, #tpu.memory_space<vmem>>, vector<128x128xf32>
    %5 = arith.truncf %4 : vector<128x128xf32> to vector<128x128xbf16>
    %cst = arith.constant dense<0.000000e+00> : vector<128x128xf32>
    %6 = tpu.matmul %3, %5, %cst {dimension_numbers = #tpu.dot_dimension_numbers<[1], [0], [0], [1], [0, 0, 1, 1], [], []>} : vector<128x128xbf16>, vector<128x128xbf16>, vector<128x128xf32> -> vector<128x128xf32>
    %7 = arith.addf %6, %4 : vector<128x128xf32>
    %8 = arith.truncf %7 : vector<128x128xf32> to vector<128x128xbf16>
    %cst_4 = arith.constant dense<0.000000e+00> : vector<128x128xf32>
    %9 = tpu.matmul %3, %8, %cst_4 {dimension_numbers = #tpu.dot_dimension_numbers<[1], [0], [0], [1], [0, 0, 1, 1], [], []>} : vector<128x128xbf16>, vector<128x128xbf16>, vector<128x128xf32> -> vector<128x128xf32>
    %10 = arith.addf %9, %4 : vector<128x128xf32>
    %11 = arith.truncf %10 : vector<128x128xf32> to vector<128x128xbf16>
    %cst_5 = arith.constant dense<0.000000e+00> : vector<128x128xf32>
    %12 = tpu.matmul %3, %11, %cst_5 {dimension_numbers = #tpu.dot_dimension_numbers<[1], [0], [0], [1], [0, 0, 1, 1], [], []>} : vector<128x128xbf16>, vector<128x128xbf16>, vector<128x128xf32> -> vector<128x128xf32>
    %13 = arith.addf %12, %4 : vector<128x128xf32>
    %c0_6 = arith.constant 0 : index
    %c0_7 = arith.constant 0 : index
    %14 = vector.load %arg3[%c0_6, %c0_7] : memref<128x128xf32, #tpu.memory_space<vmem>>, vector<128x128xf32>
    tpu.vector_store %arg3[%c0_6, %c0_7], %13 {strides = array<i32>} : memref<128x128xf32, #tpu.memory_space<vmem>>, vector<128x128xf32>,
    return
  }
  func.func @transform_0(%arg0: i32) -> (i32, i32) {
    %c0_i32 = arith.constant 0 : i32
    %c0_i32_0 = arith.constant 0 : i32
    return %c0_i32, %arg0 : i32, i32
  }
  func.func @transform_1(%arg0: i32) -> (i32, i32) {
    %c0_i32 = arith.constant 0 : i32
    %c0_i32_0 = arith.constant 0 : i32
    %c0_i32_1 = arith.constant 0 : i32
    return %c0_i32, %c0_i32_0 : i32, i32
  }
  func.func @transform_2(%arg0: i32) -> (i32, i32) {
    %c0_i32 = arith.constant 0 : i32
    %c0_i32_0 = arith.constant 0 : i32
    return %c0_i32, %arg0 : i32, i32
  }
}

module attributes {stable_mosaic.version = 11 : i64} {
  func.func @_ge_kernel_normalize(%arg0: i32, %arg1: memref<128x128xf32, #tpu.memory_space<vmem>>, %arg2: memref<128x128xf32, #tpu.memory_space<vmem>>, %arg3: memref<128x128xf32, #tpu.memory_space<vmem>>, %arg4: memref<128x128xbf16, #tpu.memory_space<vmem>>) attributes {dimension_semantics = [#tpu.dimension_semantics<arbitrary>], iteration_bounds = array<i64: 1>, scalar_prefetch = 0 : i64, scratch_operands = 1 : i64, tpu.core_type = #tpu.core_type<tc>, window_params = [{transform_indices = @transform_0, window_bounds = array<i64: 128, 128>}, {pipeline_mode = #tpu.pipeline_mode<synchronous>, transform_indices = @transform_1, window_bounds = array<i64: 128, 128>}, {transform_indices = @transform_2, window_bounds = array<i64: 128, 128>}]} {
    %c0_i32 = arith.constant 0 : i32
    %0 = arith.cmpi eq, %arg0, %c0_i32 : i32
    %1 = arith.extui %0 : i1 to i32
    %c0_i32_0 = arith.constant 0 : i32
    %2 = arith.cmpi ne, %1, %c0_i32_0 : i32
    scf.if %2 {
      %c0_8 = arith.constant 0 : index
      %c0_9 = arith.constant 0 : index
      %15 = vector.load %arg2[%c0_8, %c0_9] : memref<128x128xf32, #tpu.memory_space<vmem>>, vector<128x128xf32>
      %16 = arith.mulf %15, %15 : vector<128x128xf32>
      %cst_10 = arith.constant dense<0.000000e+00> : vector<128xf32>
      %17 = vector.multi_reduction <add>, %16, %cst_10 [1] : vector<128x128xf32> to vector<128xf32>
      %18 = vector.shape_cast %17 : vector<128xf32> to vector<128x1xf32>
      %cst_11 = arith.constant 1.000000e-24 : f32
      %19 = vector.broadcast %cst_11 : f32 to vector<128x1xf32>
      %20 = arith.maximumf %18, %19 : vector<128x1xf32>
      %21 = math.rsqrt %20 : vector<128x1xf32>
      %22 = vector.broadcast %21 : vector<128x1xf32> to vector<128x128xf32>
      %23 = arith.mulf %15, %22 : vector<128x128xf32>
      %24 = arith.truncf %23 : vector<128x128xf32> to vector<128x128xbf16>
      %c0_12 = arith.constant 0 : index
      %c0_13 = arith.constant 0 : index
      %25 = vector.load %arg4[%c0_12, %c0_13] : memref<128x128xbf16, #tpu.memory_space<vmem>>, vector<128x128xbf16>
      tpu.vector_store %arg4[%c0_12, %c0_13], %24 {strides = array<i32>} : memref<128x128xbf16, #tpu.memory_space<vmem>>, vector<128x128xbf16>,
    } else {
    }
    %c0 = arith.constant 0 : index
    %c0_1 = arith.constant 0 : index
    %3 = vector.load %arg4[%c0, %c0_1] : memref<128x128xbf16, #tpu.memory_space<vmem>>, vector<128x128xbf16>
    %c0_2 = arith.constant 0 : index
    %c0_3 = arith.constant 0 : index
    %4 = vector.load %arg1[%c0_2, %c0_3] : memref<128x128xf32, #tpu.memory_space<vmem>>, vector<128x128xf32>
    %5 = arith.truncf %4 : vector<128x128xf32> to vector<128x128xbf16>
    %cst = arith.constant dense<0.000000e+00> : vector<128x128xf32>
    %6 = tpu.matmul %3, %5, %cst {dimension_numbers = #tpu.dot_dimension_numbers<[1], [0], [0], [1], [0, 0, 1, 1], [], []>} : vector<128x128xbf16>, vector<128x128xbf16>, vector<128x128xf32> -> vector<128x128xf32>
    %7 = arith.addf %6, %4 : vector<128x128xf32>
    %8 = arith.truncf %7 : vector<128x128xf32> to vector<128x128xbf16>
    %cst_4 = arith.constant dense<0.000000e+00> : vector<128x128xf32>
    %9 = tpu.matmul %3, %8, %cst_4 {dimension_numbers = #tpu.dot_dimension_numbers<[1], [0], [0], [1], [0, 0, 1, 1], [], []>} : vector<128x128xbf16>, vector<128x128xbf16>, vector<128x128xf32> -> vector<128x128xf32>
    %10 = arith.addf %9, %4 : vector<128x128xf32>
    %11 = arith.truncf %10 : vector<128x128xf32> to vector<128x128xbf16>
    %cst_5 = arith.constant dense<0.000000e+00> : vector<128x128xf32>
    %12 = tpu.matmul %3, %11, %cst_5 {dimension_numbers = #tpu.dot_dimension_numbers<[1], [0], [0], [1], [0, 0, 1, 1], [], []>} : vector<128x128xbf16>, vector<128x128xbf16>, vector<128x128xf32> -> vector<128x128xf32>
    %13 = arith.addf %12, %4 : vector<128x128xf32>
    %c0_6 = arith.constant 0 : index
    %c0_7 = arith.constant 0 : index
    %14 = vector.load %arg3[%c0_6, %c0_7] : memref<128x128xf32, #tpu.memory_space<vmem>>, vector<128x128xf32>
    tpu.vector_store %arg3[%c0_6, %c0_7], %13 {strides = array<i32>} : memref<128x128xf32, #tpu.memory_space<vmem>>, vector<128x128xf32>,
    return
  }
  func.func @transform_0(%arg0: i32) -> (i32, i32) {
    %c0_i32 = arith.constant 0 : i32
    %c0_i32_0 = arith.constant 0 : i32
    return %c0_i32, %arg0 : i32, i32
  }
  func.func @transform_1(%arg0: i32) -> (i32, i32) {
    %c0_i32 = arith.constant 0 : i32
    %c0_i32_0 = arith.constant 0 : i32
    %c0_i32_1 = arith.constant 0 : i32
    return %c0_i32, %c0_i32_0 : i32, i32
  }
  func.func @transform_2(%arg0: i32) -> (i32, i32) {
    %c0_i32 = arith.constant 0 : i32
    %c0_i32_0 = arith.constant 0 : i32
    return %c0_i32, %arg0 : i32, i32
  }
}

</mosaic_0001>

<bundles_post_ra>
// kernel: tpu_custom_call.1
= control target key start
LH: loop header
LB: loop body
LE: loop exit
PB: predicated region body
PF: predicated region fallthrough
CT: control target
= control target key end

     0   :  { %7 = vsyncpa [#allocation4], 0  ;;  %s1343_s0 = inlined_call_operand.hbm [shape: f32[128,128], index: 0, kind: input, shape index: {}]   ;;  %s1344_s1 = inlined_call_operand.hbm [shape: f32[128,128], index: 1, kind: input, shape index: {}]   ;;  %s1345_s2 = inlined_call_operand.hbm [shape: f32[128,128], index: 2, kind: output, shape index: {}]  }
   0x1   :  { %8 = vsyncpa [#allocation7], 0 }
   0x2   :  { %9 = vsyncpa [#allocation5], 0  ;;  %s14_s11 = sshll.u32 %s1343_s0, 4  ;;  %s849_s12 = smov [#allocation3]   ;;  %s15_s11 = int_to_ptr.hbm [resolvable:$true] %s14_s11 }
   0x3   :  { %s16_s13 = sshll.u32 %s849_s12, 4  ;;  %s27_s16 = sshll.u32 %s1344_s1, 4  ;;  %s17_s13 = int_to_ptr.vmem [resolvable:$true] %s16_s13  ;;  %s28_s16 = int_to_ptr.hbm [resolvable:$true] %s27_s16 }
   0x4   :  { %s850_s17 = smov 128   ;;  %s851_s18 = smov 8  }
   0x5   :  { %22 = dma.hbm_to_vmem [thread:$0]  %s15_s11, 2048, %s17_s13, [#allocation4], %s850_s17, %s850_s17, %s851_s18  }
   0x6   :  { %s852_s19 = smov [#allocation6]  }
   0x7   :  { %s29_s20 = sshll.u32 %s852_s19, 4  ;;  %s30_s20 = int_to_ptr.vmem [resolvable:$true] %s29_s20 }
   0x8   :  { %35 = dma.hbm_to_vmem [thread:$0]  %s28_s16, 2048, %s30_s20, [#allocation7], %s850_s17, %s850_s17, %s851_s18  }
   0x9   :  { %843 = dma.done.wait [#allocation4], 2048  }
   0xa   :  { %844 = vsyncadd [#allocation4], 4294965248 }
   0xb   :  { %845 = dma.done.wait [#allocation7], 2048  }
   0xc   :  { %846 = vsyncadd [#allocation7], 4294965248  ;;  %v881_v0 = vld [vmem:[#allocation6 + $0x10] sm:$0xff]  ;;  %v883_v1 = vld [vmem:[#allocation6] sm:$0xff]  ;;  %s853_s0 = smov [#allocation8]   ;;  %s609_s23 = sshll.u32 %s1345_s2, 4  ;;  %s610_s23 = int_to_ptr.hbm [resolvable:$true] %s609_s23 }
   0xd   :  { %v885_v2 = vld [vmem:[#allocation6 + $0x20] sm:$0xff]  ;;  %v66_v3 = vmul.f32 %v881_v0, %v881_v0  ;;  %v64_v4 = vmul.f32 %v883_v1, %v883_v1  ;;  %v893_v6 = vld [vmem:[#allocation6 + $0x18] sm:$0xff]  ;;  %v895_v7 = vld [vmem:[#allocation6 + $0x8] sm:$0xff]  ;;  %s607_s1 = sshll.u32 %s853_s0, 4  ;;  %s608_s1 = int_to_ptr.vmem [resolvable:$true] %s607_s1 }
   0xe   :  { %v68_v5 = vmul.f32 %v885_v2, %v885_v2  ;;  %v897_v8 = vld [vmem:[#allocation6 + $0x28] sm:$0xff]  ;;  %v67_v9 = vmul.f32 %v893_v6, %v893_v6  ;;  %v65_v10 = vmul.f32 %v895_v7, %v895_v7  ;;  %v905_v12 = vld [vmem:[#allocation6 + $0x30] sm:$0xff]  ;;  %v907_v13 = vld [vmem:[#allocation6 + $0x38] sm:$0xff] }
   0xf   :  { %84 = vadd.xlane.f32.xlu1 %v66_v3  ;;  %80 = vadd.xlane.f32.xlu0 %v64_v4  ;;  %v69_v11 = vmul.f32 %v897_v8, %v897_v8  ;;  %v909_v14 = vld [vmem:[#allocation6 + $0x60] sm:$0xff]  ;;  %v70_v15 = vmul.f32 %v905_v12, %v905_v12  ;;  %v71_v16 = vmul.f32 %v907_v13, %v907_v13  ;;  %v917_v18 = vld [vmem:[#allocation6 + $0x68] sm:$0xff]  ;;  %v929_v24 = vld [vmem:[#allocation6 + $0x78] sm:$0xff] }
  0x10   :  { %88 = vadd.xlane.f32.xlu2 %v68_v5  ;;  %v76_v17 = vmul.f32 %v909_v14, %v909_v14  ;;  %v919_v19 = vld [vmem:[#allocation6 + $0x40] sm:$0xff]  ;;  %v921_v20 = vld [vmem:[#allocation6 + $0x48] sm:$0xff]  ;;  %v77_v21 = vmul.f32 %v917_v18, %v917_v18  ;;  %v931_v25 = vld [vmem:[#allocation6 + $0x70] sm:$0xff]  ;;  %v79_v27 = vmul.f32 %v929_v24, %v929_v24 }
  0x11   :  { %v72_v22 = vmul.f32 %v919_v19, %v919_v19  ;;  %v73_v23 = vmul.f32 %v921_v20, %v921_v20  ;;  %v933_v26 = vld [vmem:[#allocation6 + $0x50] sm:$0xff]  ;;  %v78_v28 = vmul.f32 %v931_v25, %v931_v25  ;;  %v941_v30 = vld [vmem:[#allocation6 + $0x58] sm:$0xff]  ;;  %v951_v35 = vld [vmem:[#allocation3 + $0x60] sm:$0xff] }
  0x12   :  { %v74_v29 = vmul.f32 %v933_v26, %v933_v26  ;;  %v75_v31 = vmul.f32 %v941_v30, %v941_v30  ;;  %v945_v32 = vld [vmem:[#allocation3 + $0x70] sm:$0xff]  ;;  %v947_v33 = vld [vmem:[#allocation3 + $0x78] sm:$0xff]  ;;  %v953_v36 = vld [vmem:[#allocation3 + $0x68] sm:$0xff] }
  0x13   :  { %v375_v34 = vpack.c.bf16 %v947_v33, %v945_v32  ;;  %v374_v37 = vpack.c.bf16 %v953_v36, %v951_v35  ;;  %v957_v38 = vld [vmem:[#allocation3 + $0x50] sm:$0xff]  ;;  %v959_v39 = vld [vmem:[#allocation3 + $0x58] sm:$0xff]  ;;  %v963_v41 = vld [vmem:[#allocation3 + $0x40] sm:$0xff] }
  0x14   :  { %v373_v40 = vpack.c.bf16 %v959_v39, %v957_v38  ;;  %v965_v42 = vld [vmem:[#allocation3 + $0x48] sm:$0xff]  ;;  %v969_v44 = vld [vmem:[#allocation3 + $0x30] sm:$0xff]  ;;  %v971_v45 = vld [vmem:[#allocation3 + $0x38] sm:$0xff] }
  0x15   :  { %424 = vmatpush.bf16.msra.mxu0 %v375_v34  ;;  %710 = vmatpush.bf16.msra.mxu3 %v375_v34  ;;  %v372_v43 = vpack.c.bf16 %v965_v42, %v963_v41  ;;  %v371_v46 = vpack.c.bf16 %v971_v45, %v969_v44  ;;  %v975_v47 = vld [vmem:[#allocation3 + $0x20] sm:$0xff]  ;;  %v977_v48 = vld [vmem:[#allocation3 + $0x28] sm:$0xff]  ;;  %v983_v56 = vld [vmem:[#allocation3 + $0x10] sm:$0xff] }
  0x16   :  { %v370_v49 = vpack.c.bf16 %v977_v48, %v975_v47  ;;  %v985_v57 = vld [vmem:[#allocation3 + $0x18] sm:$0xff]  ;;  %v990_v59 = vld [vmem:[#allocation3] sm:$0xff]  ;;  %v992_v60 = vld [vmem:[#allocation3 + $0x8] sm:$0xff] }
  0x17   :  { %86 = vadd.xlane.f32.xlu1 %v67_v9  ;;  %82 = vadd.xlane.f32.xlu0 %v65_v10  ;;  %v369_v58 = vpack.c.bf16 %v985_v57, %v983_v56  ;;  %v368_v61 = vpack.c.bf16 %v992_v60, %v990_v59 }
  0x18   :  { %90 = vadd.xlane.f32.xlu2 %v69_v11 }
  0x19   :  { %425 = vmatpush.bf16.msra.mxu0 %v374_v37  ;;  %711 = vmatpush.bf16.msra.mxu3 %v374_v37 }
  0x1d   :  { %426 = vmatpush.bf16.msra.mxu0 %v373_v40  ;;  %712 = vmatpush.bf16.msra.mxu3 %v373_v40 }
  0x1f   :  { %92 = vadd.xlane.f32.xlu0 %v70_v15  ;;  %94 = vadd.xlane.f32.xlu1 %v71_v16 }
  0x20   :  { %104 = vadd.xlane.f32.xlu2 %v76_v17 }
  0x21   :  { %427 = vmatpush.bf16.msra.mxu0 %v372_v43  ;;  %713 = vmatpush.bf16.msra.mxu3 %v372_v43 }
  0x25   :  { %428 = vmatpush.bf16.msra.mxu0 %v371_v46  ;;  %714 = vmatpush.bf16.msra.mxu3 %v371_v46 }
  0x27   :  { %106 = vadd.xlane.f32.xlu0 %v77_v21  ;;  %96 = vadd.xlane.f32.xlu1 %v72_v22 }
  0x28   :  { %98 = vadd.xlane.f32.xlu2 %v73_v23 }
  0x29   :  { %429 = vmatpush.bf16.msra.mxu0 %v370_v49  ;;  %715 = vmatpush.bf16.msra.mxu3 %v370_v49 }
  0x2d   :  { %430 = vmatpush.bf16.msra.mxu0 %v369_v58  ;;  %716 = vmatpush.bf16.msra.mxu3 %v369_v58 }
  0x2f   :  { %110 = vadd.xlane.f32.xlu1 %v79_v27  ;;  %108 = vadd.xlane.f32.xlu0 %v78_v28 }
  0x30   :  { %100 = vadd.xlane.f32.xlu2 %v74_v29 }
  0x31   :  { %431 = vmatpush.bf16.msra.mxu0 %v368_v61  ;;  %717 = vmatpush.bf16.msra.mxu3 %v368_v61 }
  0x37   :  { %102 = vadd.xlane.f32.xlu0 %v75_v31 }
  0x82   :  { %v85_v50 = vpop.xlane.xlu1 %84  ;;  %v81_v51 = vpop.xlane.xlu0 %80 }
  0x83   :  { %v114_v52 = vmax.f32 %v85_v50, 1e-24  ;;  %v981_v53 = vmax.f32 %v81_v51, 1e-24  ;;  %v89_v54 = vpop.xlane.xlu2 %88 }
  0x84   :  { %v116_v55 = vmax.f32 %v89_v54, 1e-24 }
  0x85   :  { %739 = vrsqrt.f32 %v114_v52  ;;  %vm154_vm0 = vweird.f32 %v114_v52  ;;  %vm134_vm2 = vweird.f32 %v981_v53 }
  0x86   :  { %741 = vrsqrt.f32 %v981_v53  ;;  %vm174_vm3 = vweird.f32 %v116_v55 }
  0x87   :  { %743 = vrsqrt.f32 %v116_v55 }
  0x8a   :  { %v87_v62 = vpop.xlane.xlu1 %86  ;;  %v83_v63 = vpop.xlane.xlu0 %82 }
  0x8b   :  { %v740_v3 = vpop.eup %739  ;;  %v996_v4 = vmax.f32 %v87_v62, 1e-24  ;;  %v998_v5 = vmax.f32 %v83_v63, 1e-24  ;;  %v91_v9 = vpop.xlane.xlu2 %90 }
  0x8c   :  { %v1000_v10 = vpop.eup %741  ;;  %v149_v11 = vmul.f32 %v740_v3, %v114_v52  ;;  %v1002_v15 = vmax.f32 %v91_v9, 1e-24  ;;  %vm155_vm1 = vweird.f32 %v740_v3 }
  0x8d   :  { %v1004_v16 = vpop.eup %743  ;;  %v129_v17 = vmul.f32 %v1000_v10, %v981_v53  ;;  %745 = vrsqrt.f32 %v996_v4  ;;  %vm1017_vm4 = vmor %vm154_vm0, %vm155_vm1  ;;  %vm135_vm5 = vweird.f32 %v1000_v10  ;;  %vm164_vm7 = vweird.f32 %v996_v4 }
  0x8e   :  { %v150_v21 = vmul.f32 %v740_v3, %v149_v11  ;;  %v169_v22 = vmul.f32 %v1004_v16, %v116_v55  ;;  %747 = vrsqrt.f32 %v998_v5  ;;  %vm175_vm6 = vweird.f32 %v1004_v16  ;;  %vm1049_vm9 = vmor %vm134_vm2, %vm135_vm5 }
  0x8f   :  { %v130_v23 = vmul.f32 %v1000_v10, %v129_v17  ;;  %749 = vrsqrt.f32 %v1002_v15  ;;  %vm1039_vm8 = vmor %vm174_vm3, %vm175_vm6  ;;  %vm144_vm11 = vweird.f32 %v998_v5  ;;  %vm184_vm12 = vweird.f32 %v1002_v15 }
  0x90   :  { %v151_v27 = vmul.f32 0.5, %v150_v21  ;;  %v170_v28 = vmul.f32 %v1004_v16, %v169_v22 }
  0x91   :  { %v131_v29 = vmul.f32 0.5, %v130_v23 }
  0x92   :  { %v152_v31 = vsub.f32 1.5, %v151_v27  ;;  %v171_v34 = vmul.f32 0.5, %v170_v28  ;;  %v93_v37 = vpop.xlane.xlu0 %92  ;;  %v95_v40 = vpop.xlane.xlu1 %94 }
  0x93   :  { %v1015_v43 = vpop.eup %745  ;;  %v132_v49 = vsub.f32 1.5, %v131_v29  ;;  %v1023_v50 = vmax.f32 %v93_v37, 1e-24  ;;  %v105_v51 = vpop.xlane.xlu2 %104  ;;  %v1031_v11 = vmax.f32 %v95_v40, 1e-24 }
  0x94   :  { %v748_v52 = vpop.eup %747  ;;  %v153_v54 = vmul.f32 %v740_v3, %v152_v31  ;;  %v172_v58 = vsub.f32 1.5, %v171_v34  ;;  %v159_v61 = vmul.f32 %v1015_v43, %v996_v4  ;;  %vm165_vm10 = vweird.f32 %v1015_v43 }
  0x95   :  { %v750_v62 = vpop.eup %749  ;;  %v133_v63 = vmul.f32 %v1000_v10, %v132_v49  ;;  %v139_v9 = vmul.f32 %v748_v52, %v998_v5  ;;  %751 = vrsqrt.f32 %v1023_v50  ;;  %vm145_vm13 = vweird.f32 %v748_v52  ;;  %vm1073_vm15 = vmor %vm164_vm7, %vm165_vm10 }
  0x96   :  { %v157_v17 = vsel %vm1017_vm4, %v740_v3, %v153_v54  ;;  %v173_v21 = vmul.f32 %v1004_v16, %v172_v58  ;;  %v160_v23 = vmul.f32 %v1015_v43, %v159_v61  ;;  %v179_v27 = vmul.f32 %v750_v62, %v1002_v15  ;;  %vm146_vm2 = vmor %vm144_vm11, %vm145_vm13 }
  0x97   :  { %v140_v3 = vmul.f32 %v748_v52, %v139_v9  ;;  %v137_v55 = vsel %vm1049_vm9, %v1000_v10, %v133_v63  ;;  %v290_v53 = vmul.f32 %v157_v17, %v881_v0  ;;  %v1063_v40 = vmax.f32 %v105_v51, 1e-24 }
  0x98   :  { %v161_v29 = vmul.f32 0.5, %v160_v23  ;;  %v180_v31 = vmul.f32 %v750_v62, %v179_v27  ;;  %v177_v34 = vsel %vm1039_vm8, %v1004_v16, %v173_v21  ;;  %vm185_vm14 = vweird.f32 %v750_v62 }
  0x99   :  { %v141_v37 = vmul.f32 0.5, %v140_v3  ;;  %753 = vrsqrt.f32 %v1031_v11  ;;  %v288_v61 = vmul.f32 %v137_v55, %v883_v1  ;;  %v292_v9 = vmul.f32 %v177_v34, %v885_v2  ;;  %vm1087_vm0 = vmor %vm184_vm12, %vm185_vm14 }
  0x9a   :  { %v162_v46 = vsub.f32 1.5, %v161_v29  ;;  %v181_v49 = vmul.f32 0.5, %v180_v31  ;;  %v107_v54 = vpop.xlane.xlu0 %106  ;;  %v97_v58 = vpop.xlane.xlu1 %96  ;;  %755 = vrsqrt.f32 %v1063_v40  ;;  %vm194_vm1 = vweird.f32 %v1023_v50 }
  0x9b   :  { %v1066_v10 = vpop.eup %751  ;;  %v142_v16 = vsub.f32 1.5, %v141_v37  ;;  %v1078_v51 = vmax.f32 %v107_v54, 1e-24  ;;  %v99_v63 = vpop.xlane.xlu2 %98  ;;  %v1093_v23 = vmax.f32 %v97_v58, 1e-24  ;;  %vm204_vm4 = vweird.f32 %v1031_v11 }
  0x9c   :  { %v163_v17 = vmul.f32 %v1015_v43, %v162_v46  ;;  %v182_v21 = vsub.f32 1.5, %v181_v49  ;;  %v189_v1 = vmul.f32 %v1066_v10, %v1023_v50  ;;  %v1102_v28 = vmax.f32 %v99_v63, 1e-24 }
  0x9d   :  { %v143_v22 = vmul.f32 %v748_v52, %v142_v16  ;;  %757 = vrsqrt.f32 %v1078_v51  ;;  %vm195_vm3 = vweird.f32 %v1066_v10  ;;  %vm254_vm5 = vweird.f32 %v1063_v40 }
  0x9e   :  { %v167_v2 = vsel %vm1073_vm15, %v1015_v43, %v163_v17  ;;  %v183_v27 = vmul.f32 %v750_v62, %v182_v21  ;;  %v190_v15 = vmul.f32 %v1066_v10, %v189_v1  ;;  %759 = vrsqrt.f32 %v1093_v23  ;;  %vm1128_vm6 = vmor %vm194_vm1, %vm195_vm3 }
  0x9f   :  { %v291_v3 = vmul.f32 %v167_v2, %v893_v6  ;;  %v147_v55 = vsel %vm146_vm2, %v748_v52, %v143_v22  ;;  %v1107_v29 = vpop.eup %753  ;;  %761 = vrsqrt.f32 %v1102_v28  ;;  %vm264_vm7 = vweird.f32 %v1078_v51 }
  0xa0   :  { %v289_v43 = vmul.f32 %v147_v55, %v895_v7  ;;  %v187_v5 = vsel %vm1087_vm0, %v750_v62, %v183_v27  ;;  %v191_v31 = vmul.f32 0.5, %v190_v15  ;;  %v1113_v34 = vpop.eup %755  ;;  %v199_v52 = vmul.f32 %v1107_v29, %v1031_v11 }
  0xa1   :  { %v671_v37 = vpack.c.bf16 %v291_v3, %v290_v53  ;;  %v293_v6 = vmul.f32 %v187_v5, %v897_v8  ;;  %v249_v7 = vmul.f32 %v1113_v34, %v1063_v40  ;;  %vm255_vm8 = vweird.f32 %v1113_v34 }
  0xa2   :  { %v666_v46 = vpack.c.bf16 %v289_v43, %v288_v61  ;;  %v192_v49 = vsub.f32 1.5, %v191_v31  ;;  %v111_v62 = vpop.xlane.xlu1 %110  ;;  %v109_v54 = vpop.xlane.xlu0 %108  ;;  %v200_v61 = vmul.f32 %v1107_v29, %v199_v52  ;;  %vm205_vm9 = vweird.f32 %v1107_v29  ;;  %vm1172_vm13 = vmor %vm254_vm5, %vm255_vm8 }
  0xa3   :  { %v1122_v58 = vpop.eup %757  ;;  %703 = vst [vmem:[#allocation2] sm:$0xff] %v671_v37   ;;  %v676_v53 = vpack.c.bf16 %v293_v6, %v292_v9  ;;  %v1133_v0 = vmax.f32 %v111_v62, 1e-24  ;;  %v1135_v16 = vmax.f32 %v109_v54, 1e-24  ;;  %v250_v17 = vmul.f32 %v1113_v34, %v249_v7  ;;  %v101_v15 = vpop.xlane.xlu2 %100  ;;  %vm1160_vm12 = vmor %vm204_vm4, %vm205_vm9 }
  0xa4   :  { %667 = vst [vmem:[#allocation2 + $0x30] sm:$0xff] %v666_v46   ;;  %v193_v63 = vmul.f32 %v1066_v10, %v192_v49  ;;  %v259_v9 = vmul.f32 %v1122_v58, %v1078_v51  ;;  %v1142_v50 = vpop.eup %759  ;;  %v201_v21 = vmul.f32 0.5, %v200_v61  ;;  %vm265_vm10 = vweird.f32 %v1122_v58 }
  0xa5   :  { %704 = vst [vmem:[#allocation2 + $0x18] sm:$0xff] %v676_v53   ;;  %763 = vrsqrt.f32 %v1133_v0  ;;  %v1147_v1 = vpop.eup %761  ;;  %v251_v4 = vmul.f32 0.5, %v250_v17  ;;  %v209_v27 = vmul.f32 %v1142_v50, %v1093_v23  ;;  %vm214_vm11 = vweird.f32 %v1093_v23  ;;  %vm1189_vm15 = vmor %vm264_vm7, %vm265_vm10 }
  0xa6   :  { %v197_v22 = vsel %vm1128_vm6, %v1066_v10, %v193_v63  ;;  %v260_v2 = vmul.f32 %v1122_v58, %v259_v9  ;;  %v202_v3 = vsub.f32 1.5, %v201_v21  ;;  %765 = vrsqrt.f32 %v1135_v16 }
  0xa7   :  { %v252_v55 = vsub.f32 1.5, %v251_v4  ;;  %v210_v5 = vmul.f32 %v1142_v50, %v209_v27  ;;  %v219_v31 = vmul.f32 %v1147_v1, %v1102_v28  ;;  %v294_v37 = vmul.f32 %v197_v22, %v905_v12 }
  0xa8   :  { %v261_v10 = vmul.f32 0.5, %v260_v2  ;;  %v203_v11 = vmul.f32 %v1107_v29, %v202_v3  ;;  %vm215_vm14 = vweird.f32 %v1142_v50  ;;  %v1178_v52 = vmax.f32 %v101_v15, 1e-24 }
  0xa9   :  { %v253_v46 = vmul.f32 %v1113_v34, %v252_v55  ;;  %v211_v7 = vmul.f32 0.5, %v210_v5  ;;  %v220_v12 = vmul.f32 %v1147_v1, %v219_v31  ;;  %vm224_vm0 = vweird.f32 %v1102_v28  ;;  %vm1209_vm1 = vmor %vm214_vm11, %vm215_vm14 }
  0xaa   :  { %v262_v49 = vsub.f32 1.5, %v261_v10  ;;  %v103_v62 = vpop.xlane.xlu0 %102  ;;  %v207_v40 = vsel %vm1160_vm12, %v1107_v29, %v203_v11  ;;  %767 = vrsqrt.f32 %v1178_v52  ;;  %vm225_vm2 = vweird.f32 %v1147_v1 }
  0xab   :  { %v764_v54 = vpop.eup %763  ;;  %v1193_v8 = vld [vmem:[#allocation2 + $0x30] sm:$0xff]  ;;  %v1197_v61 = vmax.f32 %v103_v62, 1e-24  ;;  %v257_v29 = vsel %vm1172_vm13, %v1113_v34, %v253_v46  ;;  %v295_v63 = vmul.f32 %v207_v40, %v907_v13  ;;  %v212_v17 = vsub.f32 1.5, %v211_v7  ;;  %vm1229_vm5 = vmor %vm224_vm0, %vm225_vm2 }
  0xac   :  { %v263_v51 = vmul.f32 %v1122_v58, %v262_v49  ;;  %v766_v9 = vpop.eup %765  ;;  %v300_v21 = vmul.f32 %v257_v29, %v909_v14  ;;  %v279_v4 = vmul.f32 %v764_v54, %v1133_v0  ;;  %432 = vmatmul.bf16.vlgmr.msra.gmra.mxu0 %v1193_v8  ;;  %v221_v34 = vmul.f32 0.5, %v220_v12 }
  0xad   :  { %v681_v13 = vpack.c.bf16 %v295_v63, %v294_v37  ;;  %v213_v2 = vmul.f32 %v1142_v50, %v212_v17  ;;  %v269_v23 = vmul.f32 %v766_v9, %v1135_v16  ;;  %vm284_vm3 = vweird.f32 %v1133_v0 }
  0xae   :  { %v267_v14 = vsel %vm1189_vm15, %v1122_v58, %v263_v51  ;;  %v280_v15 = vmul.f32 %v764_v54, %v279_v4  ;;  %v222_v3 = vsub.f32 1.5, %v221_v34  ;;  %vm274_vm4 = vweird.f32 %v1135_v16  ;;  %v1251_v4 = vld [vmem:[#allocation2] sm:$0xff] }
  0xaf   :  { %v301_v27 = vmul.f32 %v267_v14, %v917_v18  ;;  %705 = vst [vmem:[#allocation2 + $0x10] sm:$0xff] %v681_v13   ;;  %v217_v55 = vsel %vm1209_vm1, %v1142_v50, %v213_v2  ;;  %v270_v43 = vmul.f32 %v766_v9, %v269_v23  ;;  %769 = vrsqrt.f32 %v1197_v61 }
  0xb0   :  { %v768_v18 = vpop.eup %767  ;;  %v281_v5 = vmul.f32 0.5, %v280_v15  ;;  %vm285_vm6 = vweird.f32 %v764_v54  ;;  %v223_v31 = vmul.f32 %v1147_v1, %v222_v3  ;;  %v296_v37 = vmul.f32 %v217_v55, %v919_v19 }
  0xb1   :  { %v696_v10 = vpack.c.bf16 %v301_v27, %v300_v21  ;;  %v271_v50 = vmul.f32 0.5, %v270_v43  ;;  %vm275_vm7 = vweird.f32 %v766_v9  ;;  %v229_v6 = vmul.f32 %v768_v18, %v1178_v52  ;;  %vm286_vm8 = vmor %vm284_vm3, %vm285_vm6 }
  0xb2   :  { %v282_v28 = vsub.f32 1.5, %v281_v5  ;;  %v227_v11 = vsel %vm1229_vm5, %v1147_v1, %v223_v31  ;;  %vm276_vm9 = vmor %vm274_vm4, %vm275_vm7  ;;  %vm234_vm10 = vweird.f32 %v1178_v52  ;;  %vm235_vm11 = vweird.f32 %v768_v18 }
  0xb3   :  { %708 = vst [vmem:[#allocation2 + $0x28] sm:$0xff] %v696_v10   ;;  %v272_v46 = vsub.f32 1.5, %v271_v50  ;;  %v297_v49 = vmul.f32 %v227_v11, %v921_v20  ;;  %v230_v7 = vmul.f32 %v768_v18, %v229_v6  ;;  %vm236_vm12 = vmor %vm234_vm10, %vm235_vm11  ;;  %vm244_vm13 = vweird.f32 %v1197_v61 }
  0xb4   :  { %v283_v12 = vmul.f32 %v764_v54, %v282_v28 }
  0xb5   :  { %v770_v19 = vpop.eup %769  ;;  %v273_v62 = vmul.f32 %v766_v9, %v272_v46  ;;  %v686_v40 = vpack.c.bf16 %v297_v49, %v296_v37  ;;  %v231_v53 = vmul.f32 0.5, %v230_v7 }
  0xb6   :  { %v287_v29 = vsel %vm286_vm8, %v764_v54, %v283_v12  ;;  %v239_v1 = vmul.f32 %v770_v19, %v1197_v61  ;;  %vm245_vm14 = vweird.f32 %v770_v19  ;;  %v1260_v61 = vld [vmem:[#allocation2 + $0x18] sm:$0xff]  ;;  %v1264_v23 = vld [vmem:[#allocation2 + $0x10] sm:$0xff] }
  0xb7   :  { %v303_v0 = vmul.f32 %v287_v29, %v929_v24  ;;  %v277_v63 = vsel %vm276_vm9, %v766_v9, %v273_v62  ;;  %706 = vst [vmem:[#allocation2 + $0x8] sm:$0xff] %v686_v40   ;;  %v232_v20 = vsub.f32 1.5, %v231_v53  ;;  %vm246_vm15 = vmor %vm244_vm13, %vm245_vm14 }
  0xb8   :  { %v302_v51 = vmul.f32 %v277_v63, %v931_v25  ;;  %v240_v17 = vmul.f32 %v770_v19, %v239_v1 }
  0xb9   :  { %v233_v21 = vmul.f32 %v768_v18, %v232_v20 }
  0xba   :  { %v1249_v16 = vld [vmem:[#allocation2 + $0x28] sm:$0xff]  ;;  %v701_v22 = vpack.c.bf16 %v303_v0, %v302_v51  ;;  %v241_v54 = vmul.f32 0.5, %v240_v17 }
  0xbb   :  { %462 = vmatmul.bf16.vlgmr.msra.gmra.mxu3 %v1249_v16  ;;  %v237_v24 = vsel %vm236_vm12, %v768_v18, %v233_v21 }
  0xbc   :  { %709 = vst [vmem:[#allocation2 + $0x38] sm:$0xff] %v701_v22   ;;  %437 = vmatmul.bf16.gmra.mxu0 %v1251_v4  ;;  %v242_v52 = vsub.f32 1.5, %v241_v54  ;;  %v298_v9 = vmul.f32 %v237_v24, %v933_v26 }
  0xbe   :  { %v243_v25 = vmul.f32 %v770_v19, %v242_v52  ;;  %v1267_v27 = vld [vmem:[#allocation2 + $0x8] sm:$0xff] }
  0xc0   :  { %v247_v34 = vsel %vm246_vm15, %v770_v19, %v243_v25 }
  0xc1   :  { %v299_v13 = vmul.f32 %v247_v34, %v941_v30 }
  0xc3   :  { %v691_v14 = vpack.c.bf16 %v299_v13, %v298_v9  ;;  %v1258_v2 = vld [vmem:[#allocation2 + $0x38] sm:$0xff] }
  0xc5   :  { %707 = vst [vmem:[#allocation2 + $0x20] sm:$0xff] %v691_v14  }
  0xcb   :  { %467 = vmatmul.bf16.gmra.mxu3 %v1258_v2 }
  0xcc   :  { %442 = vmatmul.bf16.gmra.mxu0 %v1260_v61  ;;  %v1270_v26 = vld [vmem:[#allocation2 + $0x20] sm:$0xff] }
  0xdc   :  { %447 = vmatmul.bf16.gmra.mxu0 %v1264_v23 }
  0xec   :  { %452 = vmatmul.bf16.gmra.mxu0 %v1267_v27 }
  0xfc   :  { %457 = vmatmul.bf16.gmra.mxu0 %v1270_v26 }
 0x129   :  { %v433_v30 = vpop.f32.mrf.mxu0 }
 0x12a   :  { %v434_v3 = vadd.f32 %v433_v30, %v990_v59 }
 0x131   :  { %v435_v15 = vpop.f32.mrf.mxu0 }
 0x132   :  { %v436_v55 = vadd.f32 %v435_v15, %v992_v60 }
 0x134   :  { %v473_v43 = vpack.c.bf16 %v436_v55, %v434_v3 }
 0x139   :  { %v438_v58 = vpop.f32.mrf.mxu0 }
 0x13a   :  { %v439_v5 = vadd.f32 %v438_v58, %v983_v56 }
 0x13e   :  { %v463_v18 = vpop.f32.mrf.mxu3 }
 0x13f   :  { %v464_v12 = vadd.f32 %v463_v18, %v951_v35 }
 0x141   :  { %v440_v10 = vpop.f32.mrf.mxu0 }
 0x142   :  { %v441_v31 = vadd.f32 %v440_v10, %v985_v57 }
 0x144   :  { %v474_v37 = vpack.c.bf16 %v441_v31, %v439_v5 }
 0x146   :  { %v465_v50 = vpop.f32.mrf.mxu3 }
 0x147   :  { %v466_v19 = vadd.f32 %v465_v50, %v953_v36 }
 0x149   :  { %v443_v6 = vpop.f32.mrf.mxu0  ;;  %v479_v53 = vpack.c.bf16 %v466_v19, %v464_v12 }
 0x14a   :  { %v444_v13 = vadd.f32 %v443_v6, %v975_v47 }
 0x14e   :  { %v468_v28 = vpop.f32.mrf.mxu3 }
 0x14f   :  { %v469_v46 = vadd.f32 %v468_v28, %v945_v32 }
 0x151   :  { %v445_v11 = vpop.f32.mrf.mxu0 }
 0x152   :  { %v446_v9 = vadd.f32 %v445_v11, %v977_v48 }
 0x154   :  { %v475_v14 = vpack.c.bf16 %v446_v9, %v444_v13 }
 0x156   :  { %v470_v49 = vpop.f32.mrf.mxu3 }
 0x157   :  { %v471_v7 = vadd.f32 %v470_v49, %v947_v33 }
 0x159   :  { %v448_v62 = vpop.f32.mrf.mxu0  ;;  %v480_v40 = vpack.c.bf16 %v471_v7, %v469_v46 }
 0x15a   :  { %v449_v25 = vadd.f32 %v448_v62, %v969_v44 }
 0x15b   :  { %481 = vmatpush.bf16.msra.mxu1 %v480_v40  ;;  %718 = vmatpush.bf16.msrb.mxu3 %v480_v40 }
 0x15f   :  { %482 = vmatpush.bf16.msra.mxu1 %v479_v53  ;;  %719 = vmatpush.bf16.msrb.mxu3 %v479_v53 }
 0x161   :  { %v450_v29 = vpop.f32.mrf.mxu0 }
 0x162   :  { %v451_v24 = vadd.f32 %v450_v29, %v971_v45 }
 0x164   :  { %v476_v34 = vpack.c.bf16 %v451_v24, %v449_v25 }
 0x169   :  { %v453_v1 = vpop.f32.mrf.mxu0 }
 0x16a   :  { %v454_v54 = vadd.f32 %v453_v1, %v963_v41 }
 0x171   :  { %v455_v0 = vpop.f32.mrf.mxu0 }
 0x172   :  { %v456_v21 = vadd.f32 %v455_v0, %v965_v42 }
 0x174   :  { %v477_v52 = vpack.c.bf16 %v456_v21, %v454_v54 }
 0x179   :  { %v458_v63 = vpop.f32.mrf.mxu0 }
 0x17a   :  { %v459_v51 = vadd.f32 %v458_v63, %v957_v38 }
 0x181   :  { %v460_v20 = vpop.f32.mrf.mxu0 }
 0x182   :  { %v461_v17 = vadd.f32 %v460_v20, %v959_v39 }
 0x184   :  { %v478_v22 = vpack.c.bf16 %v461_v17, %v459_v51 }
 0x186   :  { %483 = vmatpush.bf16.msra.mxu1 %v478_v22  ;;  %720 = vmatpush.bf16.msrb.mxu3 %v478_v22 }
 0x18a   :  { %484 = vmatpush.bf16.msra.mxu1 %v477_v52  ;;  %721 = vmatpush.bf16.msrb.mxu3 %v477_v52 }
 0x18e   :  { %485 = vmatpush.bf16.msra.mxu1 %v476_v34  ;;  %722 = vmatpush.bf16.msrb.mxu3 %v476_v34 }
 0x192   :  { %486 = vmatpush.bf16.msra.mxu1 %v475_v14  ;;  %723 = vmatpush.bf16.msrb.mxu3 %v475_v14 }
 0x196   :  { %487 = vmatpush.bf16.msra.mxu1 %v474_v37  ;;  %724 = vmatpush.bf16.msrb.mxu3 %v474_v37 }
 0x19a   :  { %488 = vmatpush.bf16.msra.mxu1 %v473_v43  ;;  %725 = vmatpush.bf16.msrb.mxu3 %v473_v43 }
 0x19d   :  { %489 = vmatmul.bf16.vlgmr.msra.gmra.mxu1 %v1193_v8  ;;  %519 = vmatmul.bf16.vlgmr.msrb.gmra.mxu3 %v1249_v16 }
 0x1ad   :  { %494 = vmatmul.bf16.gmra.mxu1 %v1251_v4  ;;  %524 = vmatmul.bf16.gmra.mxu3 %v1258_v2 }
 0x1bd   :  { %499 = vmatmul.bf16.gmra.mxu1 %v1260_v61 }
 0x1cd   :  { %504 = vmatmul.bf16.gmra.mxu1 %v1264_v23 }
 0x1dd   :  { %509 = vmatmul.bf16.gmra.mxu1 %v1267_v27 }
 0x1ed   :  { %514 = vmatmul.bf16.gmra.mxu1 %v1270_v26 }
 0x21a   :  { %v490_v30 = vpop.f32.mrf.mxu1 }
 0x21b   :  { %v491_v55 = vadd.f32 %v490_v30, %v990_v59 }
 0x220   :  { %v520_v15 = vpop.f32.mrf.mxu3 }
 0x221   :  { %v521_v19 = vadd.f32 %v520_v15, %v951_v35 }
 0x222   :  { %v492_v3 = vpop.f32.mrf.mxu1 }
 0x223   :  { %v493_v43 = vadd.f32 %v492_v3, %v992_v60 }
 0x225   :  { %v530_v58 = vpack.c.bf16 %v493_v43, %v491_v55 }
 0x228   :  { %v522_v18 = vpop.f32.mrf.mxu3 }
 0x229   :  { %v523_v7 = vadd.f32 %v522_v18, %v953_v36 }
 0x22a   :  { %v495_v10 = vpop.f32.mrf.mxu1 }
 0x22b   :  { %v496_v37 = vadd.f32 %v495_v10, %v983_v56  ;;  %v536_v62 = vpack.c.bf16 %v523_v7, %v521_v19 }
 0x230   :  { %v525_v5 = vpop.f32.mrf.mxu3 }
 0x231   :  { %v526_v11 = vadd.f32 %v525_v5, %v945_v32 }
 0x232   :  { %v497_v31 = vpop.f32.mrf.mxu1 }
 0x233   :  { %v498_v50 = vadd.f32 %v497_v31, %v985_v57 }
 0x235   :  { %v531_v6 = vpack.c.bf16 %v498_v50, %v496_v37 }
 0x238   :  { %v527_v28 = vpop.f32.mrf.mxu3 }
 0x239   :  { %v528_v46 = vadd.f32 %v527_v28, %v947_v33 }
 0x23a   :  { %v500_v49 = vpop.f32.mrf.mxu1 }
 0x23b   :  { %v537_v12 = vpack.c.bf16 %v528_v46, %v526_v11  ;;  %v501_v13 = vadd.f32 %v500_v49, %v975_v47 }
 0x23d   :  { %538 = vmatpush.bf16.msra.mxu2 %v537_v12  ;;  %726 = vmatpush.bf16.msra.mxu3 %v537_v12 }
 0x241   :  { %539 = vmatpush.bf16.msra.mxu2 %v536_v62  ;;  %727 = vmatpush.bf16.msra.mxu3 %v536_v62 }
 0x242   :  { %v502_v40 = vpop.f32.mrf.mxu1 }
 0x243   :  { %v503_v9 = vadd.f32 %v502_v40, %v977_v48 }
 0x245   :  { %v532_v14 = vpack.c.bf16 %v503_v9, %v501_v13 }
 0x24a   :  { %v505_v53 = vpop.f32.mrf.mxu1 }
 0x24b   :  { %v506_v25 = vadd.f32 %v505_v53, %v969_v44 }
 0x252   :  { %v507_v29 = vpop.f32.mrf.mxu1 }
 0x253   :  { %v508_v24 = vadd.f32 %v507_v29, %v971_v45 }
 0x255   :  { %v533_v34 = vpack.c.bf16 %v508_v24, %v506_v25 }
 0x25a   :  { %v510_v1 = vpop.f32.mrf.mxu1 }
 0x25b   :  { %v511_v54 = vadd.f32 %v510_v1, %v963_v41 }
 0x262   :  { %v512_v0 = vpop.f32.mrf.mxu1 }
 0x263   :  { %v513_v21 = vadd.f32 %v512_v0, %v965_v42 }
 0x265   :  { %v534_v52 = vpack.c.bf16 %v513_v21, %v511_v54 }
 0x26a   :  { %v515_v63 = vpop.f32.mrf.mxu1 }
 0x26b   :  { %v516_v51 = vadd.f32 %v515_v63, %v957_v38 }
 0x272   :  { %v517_v20 = vpop.f32.mrf.mxu1 }
 0x273   :  { %v518_v17 = vadd.f32 %v517_v20, %v959_v39 }
 0x275   :  { %v535_v22 = vpack.c.bf16 %v518_v17, %v516_v51 }
 0x277   :  { %540 = vmatpush.bf16.msra.mxu2 %v535_v22  ;;  %728 = vmatpush.bf16.msra.mxu3 %v535_v22 }
 0x27b   :  { %541 = vmatpush.bf16.msra.mxu2 %v534_v52  ;;  %729 = vmatpush.bf16.msra.mxu3 %v534_v52 }
 0x27f   :  { %542 = vmatpush.bf16.msra.mxu2 %v533_v34  ;;  %730 = vmatpush.bf16.msra.mxu3 %v533_v34 }
 0x283   :  { %543 = vmatpush.bf16.msra.mxu2 %v532_v14  ;;  %731 = vmatpush.bf16.msra.mxu3 %v532_v14 }
 0x287   :  { %544 = vmatpush.bf16.msra.mxu2 %v531_v6  ;;  %732 = vmatpush.bf16.msra.mxu3 %v531_v6 }
 0x28b   :  { %545 = vmatpush.bf16.msra.mxu2 %v530_v58  ;;  %733 = vmatpush.bf16.msra.mxu3 %v530_v58 }
 0x28e   :  { %546 = vmatmul.bf16.vlgmr.msra.gmra.mxu2 %v1193_v8  ;;  %576 = vmatmul.bf16.vlgmr.msra.gmra.mxu3 %v1249_v16 }
 0x29e   :  { %551 = vmatmul.bf16.gmra.mxu2 %v1251_v4  ;;  %581 = vmatmul.bf16.gmra.mxu3 %v1258_v2 }
 0x2ae   :  { %556 = vmatmul.bf16.gmra.mxu2 %v1260_v61 }
 0x2be   :  { %561 = vmatmul.bf16.gmra.mxu2 %v1264_v23 }
 0x2ce   :  { %566 = vmatmul.bf16.gmra.mxu2 %v1267_v27 }
 0x2de   :  { %571 = vmatmul.bf16.gmra.mxu2 %v1270_v26 }
 0x311   :  { %v547_v30 = vpop.f32.mrf.mxu2  ;;  %v577_v15 = vpop.f32.mrf.mxu3 }
 0x312   :  { %v548_v3 = vadd.f32 %v547_v30, %v990_v59  ;;  %v578_v8 = vadd.f32 %v577_v15, %v951_v35 }
 0x314   :  { %587 = vst [vmem:[#allocation8] sm:$0xff] %v548_v3 }
 0x315   :  { %599 = vst [vmem:[#allocation8 + $0x60] sm:$0xff] %v578_v8 }
 0x319   :  { %v549_v16 = vpop.f32.mrf.mxu2  ;;  %v579_v4 = vpop.f32.mrf.mxu3 }
 0x31a   :  { %v550_v2 = vadd.f32 %v549_v16, %v992_v60  ;;  %v580_v61 = vadd.f32 %v579_v4, %v953_v36 }
 0x31c   :  { %588 = vst [vmem:[#allocation8 + $0x8] sm:$0xff] %v550_v2 }
 0x31d   :  { %600 = vst [vmem:[#allocation8 + $0x68] sm:$0xff] %v580_v61 }
 0x321   :  { %v552_v23 = vpop.f32.mrf.mxu2  ;;  %v582_v27 = vpop.f32.mrf.mxu3 }
 0x322   :  { %v553_v26 = vadd.f32 %v552_v23, %v983_v56  ;;  %v583_v55 = vadd.f32 %v582_v27, %v945_v32 }
 0x324   :  { %589 = vst [vmem:[#allocation8 + $0x10] sm:$0xff] %v553_v26 }
 0x325   :  { %601 = vst [vmem:[#allocation8 + $0x70] sm:$0xff] %v583_v55 }
 0x329   :  { %v554_v59 = vpop.f32.mrf.mxu2  ;;  %v584_v35 = vpop.f32.mrf.mxu3 }
 0x32a   :  { %v555_v43 = vadd.f32 %v554_v59, %v985_v57  ;;  %v585_v58 = vadd.f32 %v584_v35, %v947_v33 }
 0x32c   :  { %590 = vst [vmem:[#allocation8 + $0x18] sm:$0xff] %v555_v43 }
 0x32d   :  { %602 = vst [vmem:[#allocation8 + $0x78] sm:$0xff] %v585_v58 }
 0x331   :  { %v557_v60 = vpop.f32.mrf.mxu2 }
 0x332   :  { %v558_v36 = vadd.f32 %v557_v60, %v975_v47 }
 0x334   :  { %591 = vst [vmem:[#allocation8 + $0x20] sm:$0xff] %v558_v36 }
 0x339   :  { %v559_v18 = vpop.f32.mrf.mxu2 }
 0x33a   :  { %v560_v10 = vadd.f32 %v559_v18, %v977_v48 }
 0x33c   :  { %592 = vst [vmem:[#allocation8 + $0x28] sm:$0xff] %v560_v10 }
 0x341   :  { %v562_v56 = vpop.f32.mrf.mxu2 }
 0x342   :  { %v563_v32 = vadd.f32 %v562_v56, %v969_v44 }
 0x344   :  { %593 = vst [vmem:[#allocation8 + $0x30] sm:$0xff] %v563_v32 }
 0x349   :  { %v564_v5 = vpop.f32.mrf.mxu2 }
 0x34a   :  { %v565_v31 = vadd.f32 %v564_v5, %v971_v45 }
 0x34c   :  { %594 = vst [vmem:[#allocation8 + $0x38] sm:$0xff] %v565_v31 }
 0x351   :  { %v567_v57 = vpop.f32.mrf.mxu2 }
 0x352   :  { %v568_v33 = vadd.f32 %v567_v57, %v963_v41 }
 0x354   :  { %595 = vst [vmem:[#allocation8 + $0x40] sm:$0xff] %v568_v33 }
 0x359   :  { %v569_v37 = vpop.f32.mrf.mxu2 }
 0x35a   :  { %v570_v47 = vadd.f32 %v569_v37, %v965_v42 }
 0x35c   :  { %596 = vst [vmem:[#allocation8 + $0x48] sm:$0xff] %v570_v47 }
 0x361   :  { %v572_v50 = vpop.f32.mrf.mxu2 }
 0x362   :  { %v573_v48 = vadd.f32 %v572_v50, %v957_v38 }
 0x364   :  { %597 = vst [vmem:[#allocation8 + $0x50] sm:$0xff] %v573_v48 }
 0x369   :  { %v574_v44 = vpop.f32.mrf.mxu2 }
 0x36a   :  { %v575_v45 = vadd.f32 %v574_v44, %v959_v39 }
 0x36c   :  { %598 = vst [vmem:[#allocation8 + $0x58] sm:$0xff] %v575_v45 }
 0x36d   :  { %615 = dma.vmem_to_hbm [thread:$0]  %s608_s1, 2048, %s610_s23, [#allocation5], %s850_s17, %s850_s17, %s851_s18  }
 0x36e   :  { %847 = dma.done.wait [#allocation5], 2048  }
 0x36f   :  { %848 = vsyncadd [#allocation5], 4294965248 }
 0x370   :  { %620 = vsyncpa [#allocation4], 1 }
 0x371   :  { %621 = vsyncpa [#allocation7], 1 }
 0x372   :  { %622 = vsyncpa [#allocation5], 1 }

// kernel: tpu_custom_call.1
= control target key start
LH: loop header
LB: loop body
LE: loop exit
PB: predicated region body
PF: predicated region fallthrough
CT: control target
= control target key end

     0   :  { %7 = vsyncpa [#allocation4], 0  ;;  %s1343_s0 = inlined_call_operand.hbm [shape: f32[128,128], index: 0, kind: input, shape index: {}]   ;;  %s1344_s1 = inlined_call_operand.hbm [shape: f32[128,128], index: 1, kind: input, shape index: {}]   ;;  %s1345_s2 = inlined_call_operand.hbm [shape: f32[128,128], index: 2, kind: output, shape index: {}]  }
   0x1   :  { %8 = vsyncpa [#allocation7], 0 }
   0x2   :  { %9 = vsyncpa [#allocation5], 0  ;;  %s14_s11 = sshll.u32 %s1343_s0, 4  ;;  %s849_s12 = smov [#allocation3]   ;;  %s15_s11 = int_to_ptr.hbm [resolvable:$true] %s14_s11 }
   0x3   :  { %s16_s13 = sshll.u32 %s849_s12, 4  ;;  %s27_s16 = sshll.u32 %s1344_s1, 4  ;;  %s17_s13 = int_to_ptr.vmem [resolvable:$true] %s16_s13  ;;  %s28_s16 = int_to_ptr.hbm [resolvable:$true] %s27_s16 }
   0x4   :  { %s850_s17 = smov 128   ;;  %s851_s18 = smov 8  }
   0x5   :  { %22 = dma.hbm_to_vmem [thread:$0]  %s15_s11, 2048, %s17_s13, [#allocation4], %s850_s17, %s850_s17, %s851_s18  }
   0x6   :  { %s852_s19 = smov [#allocation6]  }
   0x7   :  { %s29_s20 = sshll.u32 %s852_s19, 4  ;;  %s30_s20 = int_to_ptr.vmem [resolvable:$true] %s29_s20 }
   0x8   :  { %35 = dma.hbm_to_vmem [thread:$0]  %s28_s16, 2048, %s30_s20, [#allocation7], %s850_s17, %s850_s17, %s851_s18  }
   0x9   :  { %843 = dma.done.wait [#allocation4], 2048  }
   0xa   :  { %844 = vsyncadd [#allocation4], 4294965248 }
   0xb   :  { %845 = dma.done.wait [#allocation7], 2048  }
   0xc   :  { %846 = vsyncadd [#allocation7], 4294965248  ;;  %v881_v0 = vld [vmem:[#allocation6 + $0x10] sm:$0xff]  ;;  %v883_v1 = vld [vmem:[#allocation6] sm:$0xff]  ;;  %s853_s0 = smov [#allocation8]   ;;  %s609_s23 = sshll.u32 %s1345_s2, 4  ;;  %s610_s23 = int_to_ptr.hbm [resolvable:$true] %s609_s23 }
   0xd   :  { %v885_v2 = vld [vmem:[#allocation6 + $0x20] sm:$0xff]  ;;  %v66_v3 = vmul.f32 %v881_v0, %v881_v0  ;;  %v64_v4 = vmul.f32 %v883_v1, %v883_v1  ;;  %v893_v6 = vld [vmem:[#allocation6 + $0x18] sm:$0xff]  ;;  %v895_v7 = vld [vmem:[#allocation6 + $0x8] sm:$0xff]  ;;  %s607_s1 = sshll.u32 %s853_s0, 4  ;;  %s608_s1 = int_to_ptr.vmem [resolvable:$true] %s607_s1 }
   0xe   :  { %v68_v5 = vmul.f32 %v885_v2, %v885_v2  ;;  %v897_v8 = vld [vmem:[#allocation6 + $0x28] sm:$0xff]  ;;  %v67_v9 = vmul.f32 %v893_v6, %v893_v6  ;;  %v65_v10 = vmul.f32 %v895_v7, %v895_v7  ;;  %v905_v12 = vld [vmem:[#allocation6 + $0x30] sm:$0xff]  ;;  %v907_v13 = vld [vmem:[#allocation6 + $0x38] sm:$0xff] }
   0xf   :  { %84 = vadd.xlane.f32.xlu1 %v66_v3  ;;  %80 = vadd.xlane.f32.xlu0 %v64_v4  ;;  %v69_v11 = vmul.f32 %v897_v8, %v897_v8  ;;  %v909_v14 = vld [vmem:[#allocation6 + $0x60] sm:$0xff]  ;;  %v70_v15 = vmul.f32 %v905_v12, %v905_v12  ;;  %v71_v16 = vmul.f32 %v907_v13, %v907_v13  ;;  %v917_v18 = vld [vmem:[#allocation6 + $0x68] sm:$0xff]  ;;  %v929_v24 = vld [vmem:[#allocation6 + $0x78] sm:$0xff] }
  0x10   :  { %88 = vadd.xlane.f32.xlu2 %v68_v5  ;;  %v76_v17 = vmul.f32 %v909_v14, %v909_v14  ;;  %v919_v19 = vld [vmem:[#allocation6 + $0x40] sm:$0xff]  ;;  %v921_v20 = vld [vmem:[#allocation6 + $0x48] sm:$0xff]  ;;  %v77_v21 = vmul.f32 %v917_v18, %v917_v18  ;;  %v931_v25 = vld [vmem:[#allocation6 + $0x70] sm:$0xff]  ;;  %v79_v27 = vmul.f32 %v929_v24, %v929_v24 }
  0x11   :  { %v72_v22 = vmul.f32 %v919_v19, %v919_v19  ;;  %v73_v23 = vmul.f32 %v921_v20, %v921_v20  ;;  %v933_v26 = vld [vmem:[#allocation6 + $0x50] sm:$0xff]  ;;  %v78_v28 = vmul.f32 %v931_v25, %v931_v25  ;;  %v941_v30 = vld [vmem:[#allocation6 + $0x58] sm:$0xff]  ;;  %v951_v35 = vld [vmem:[#allocation3 + $0x60] sm:$0xff] }
  0x12   :  { %v74_v29 = vmul.f32 %v933_v26, %v933_v26  ;;  %v75_v31 = vmul.f32 %v941_v30, %v941_v30  ;;  %v945_v32 = vld [vmem:[#allocation3 + $0x70] sm:$0xff]  ;;  %v947_v33 = vld [vmem:[#allocation3 + $0x78] sm:$0xff]  ;;  %v953_v36 = vld [vmem:[#allocation3 + $0x68] sm:$0xff] }
  0x13   :  { %v375_v34 = vpack.c.bf16 %v947_v33, %v945_v32  ;;  %v374_v37 = vpack.c.bf16 %v953_v36, %v951_v35  ;;  %v957_v38 = vld [vmem:[#allocation3 + $0x50] sm:$0xff]  ;;  %v959_v39 = vld [vmem:[#allocation3 + $0x58] sm:$0xff]  ;;  %v963_v41 = vld [vmem:[#allocation3 + $0x40] sm:$0xff] }
  0x14   :  { %v373_v40 = vpack.c.bf16 %v959_v39, %v957_v38  ;;  %v965_v42 = vld [vmem:[#allocation3 + $0x48] sm:$0xff]  ;;  %v969_v44 = vld [vmem:[#allocation3 + $0x30] sm:$0xff]  ;;  %v971_v45 = vld [vmem:[#allocation3 + $0x38] sm:$0xff] }
  0x15   :  { %424 = vmatpush.bf16.msra.mxu0 %v375_v34  ;;  %710 = vmatpush.bf16.msra.mxu3 %v375_v34  ;;  %v372_v43 = vpack.c.bf16 %v965_v42, %v963_v41  ;;  %v371_v46 = vpack.c.bf16 %v971_v45, %v969_v44  ;;  %v975_v47 = vld [vmem:[#allocation3 + $0x20] sm:$0xff]  ;;  %v977_v48 = vld [vmem:[#allocation3 + $0x28] sm:$0xff]  ;;  %v983_v56 = vld [vmem:[#allocation3 + $0x10] sm:$0xff] }
  0x16   :  { %v370_v49 = vpack.c.bf16 %v977_v48, %v975_v47  ;;  %v985_v57 = vld [vmem:[#allocation3 + $0x18] sm:$0xff]  ;;  %v990_v59 = vld [vmem:[#allocation3] sm:$0xff]  ;;  %v992_v60 = vld [vmem:[#allocation3 + $0x8] sm:$0xff] }
  0x17   :  { %86 = vadd.xlane.f32.xlu1 %v67_v9  ;;  %82 = vadd.xlane.f32.xlu0 %v65_v10  ;;  %v369_v58 = vpack.c.bf16 %v985_v57, %v983_v56  ;;  %v368_v61 = vpack.c.bf16 %v992_v60, %v990_v59 }
  0x18   :  { %90 = vadd.xlane.f32.xlu2 %v69_v11 }
  0x19   :  { %425 = vmatpush.bf16.msra.mxu0 %v374_v37  ;;  %711 = vmatpush.bf16.msra.mxu3 %v374_v37 }
  0x1d   :  { %426 = vmatpush.bf16.msra.mxu0 %v373_v40  ;;  %712 = vmatpush.bf16.msra.mxu3 %v373_v40 }
  0x1f   :  { %92 = vadd.xlane.f32.xlu0 %v70_v15  ;;  %94 = vadd.xlane.f32.xlu1 %v71_v16 }
  0x20   :  { %104 = vadd.xlane.f32.xlu2 %v76_v17 }
  0x21   :  { %427 = vmatpush.bf16.msra.mxu0 %v372_v43  ;;  %713 = vmatpush.bf16.msra.mxu3 %v372_v43 }
  0x25   :  { %428 = vmatpush.bf16.msra.mxu0 %v371_v46  ;;  %714 = vmatpush.bf16.msra.mxu3 %v371_v46 }
  0x27   :  { %106 = vadd.xlane.f32.xlu0 %v77_v21  ;;  %96 = vadd.xlane.f32.xlu1 %v72_v22 }
  0x28   :  { %98 = vadd.xlane.f32.xlu2 %v73_v23 }
  0x29   :  { %429 = vmatpush.bf16.msra.mxu0 %v370_v49  ;;  %715 = vmatpush.bf16.msra.mxu3 %v370_v49 }
  0x2d   :  { %430 = vmatpush.bf16.msra.mxu0 %v369_v58  ;;  %716 = vmatpush.bf16.msra.mxu3 %v369_v58 }
  0x2f   :  { %110 = vadd.xlane.f32.xlu1 %v79_v27  ;;  %108 = vadd.xlane.f32.xlu0 %v78_v28 }
  0x30   :  { %100 = vadd.xlane.f32.xlu2 %v74_v29 }
  0x31   :  { %431 = vmatpush.bf16.msra.mxu0 %v368_v61  ;;  %717 = vmatpush.bf16.msra.mxu3 %v368_v61 }
  0x37   :  { %102 = vadd.xlane.f32.xlu0 %v75_v31 }
  0x82   :  { %v85_v50 = vpop.xlane.xlu1 %84  ;;  %v81_v51 = vpop.xlane.xlu0 %80 }
  0x83   :  { %v114_v52 = vmax.f32 %v85_v50, 1e-24  ;;  %v981_v53 = vmax.f32 %v81_v51, 1e-24  ;;  %v89_v54 = vpop.xlane.xlu2 %88 }
  0x84   :  { %v116_v55 = vmax.f32 %v89_v54, 1e-24 }
  0x85   :  { %739 = vrsqrt.f32 %v114_v52  ;;  %vm154_vm0 = vweird.f32 %v114_v52  ;;  %vm134_vm2 = vweird.f32 %v981_v53 }
  0x86   :  { %741 = vrsqrt.f32 %v981_v53  ;;  %vm174_vm3 = vweird.f32 %v116_v55 }
  0x87   :  { %743 = vrsqrt.f32 %v116_v55 }
  0x8a   :  { %v87_v62 = vpop.xlane.xlu1 %86  ;;  %v83_v63 = vpop.xlane.xlu0 %82 }
  0x8b   :  { %v740_v3 = vpop.eup %739  ;;  %v996_v4 = vmax.f32 %v87_v62, 1e-24  ;;  %v998_v5 = vmax.f32 %v83_v63, 1e-24  ;;  %v91_v9 = vpop.xlane.xlu2 %90 }
  0x8c   :  { %v1000_v10 = vpop.eup %741  ;;  %v149_v11 = vmul.f32 %v740_v3, %v114_v52  ;;  %v1002_v15 = vmax.f32 %v91_v9, 1e-24  ;;  %vm155_vm1 = vweird.f32 %v740_v3 }
  0x8d   :  { %v1004_v16 = vpop.eup %743  ;;  %v129_v17 = vmul.f32 %v1000_v10, %v981_v53  ;;  %745 = vrsqrt.f32 %v996_v4  ;;  %vm1017_vm4 = vmor %vm154_vm0, %vm155_vm1  ;;  %vm135_vm5 = vweird.f32 %v1000_v10  ;;  %vm164_vm7 = vweird.f32 %v996_v4 }
  0x8e   :  { %v150_v21 = vmul.f32 %v740_v3, %v149_v11  ;;  %v169_v22 = vmul.f32 %v1004_v16, %v116_v55  ;;  %747 = vrsqrt.f32 %v998_v5  ;;  %vm175_vm6 = vweird.f32 %v1004_v16  ;;  %vm1049_vm9 = vmor %vm134_vm2, %vm135_vm5 }
  0x8f   :  { %v130_v23 = vmul.f32 %v1000_v10, %v129_v17  ;;  %749 = vrsqrt.f32 %v1002_v15  ;;  %vm1039_vm8 = vmor %vm174_vm3, %vm175_vm6  ;;  %vm144_vm11 = vweird.f32 %v998_v5  ;;  %vm184_vm12 = vweird.f32 %v1002_v15 }
  0x90   :  { %v151_v27 = vmul.f32 0.5, %v150_v21  ;;  %v170_v28 = vmul.f32 %v1004_v16, %v169_v22 }
  0x91   :  { %v131_v29 = vmul.f32 0.5, %v130_v23 }
  0x92   :  { %v152_v31 = vsub.f32 1.5, %v151_v27  ;;  %v171_v34 = vmul.f32 0.5, %v170_v28  ;;  %v93_v37 = vpop.xlane.xlu0 %92  ;;  %v95_v40 = vpop.xlane.xlu1 %94 }
  0x93   :  { %v1015_v43 = vpop.eup %745  ;;  %v132_v49 = vsub.f32 1.5, %v131_v29  ;;  %v1023_v50 = vmax.f32 %v93_v37, 1e-24  ;;  %v105_v51 = vpop.xlane.xlu2 %104  ;;  %v1031_v11 = vmax.f32 %v95_v40, 1e-24 }
  0x94   :  { %v748_v52 = vpop.eup %747  ;;  %v153_v54 = vmul.f32 %v740_v3, %v152_v31  ;;  %v172_v58 = vsub.f32 1.5, %v171_v34  ;;  %v159_v61 = vmul.f32 %v1015_v43, %v996_v4  ;;  %vm165_vm10 = vweird.f32 %v1015_v43 }
  0x95   :  { %v750_v62 = vpop.eup %749  ;;  %v133_v63 = vmul.f32 %v1000_v10, %v132_v49  ;;  %v139_v9 = vmul.f32 %v748_v52, %v998_v5  ;;  %751 = vrsqrt.f32 %v1023_v50  ;;  %vm145_vm13 = vweird.f32 %v748_v52  ;;  %vm1073_vm15 = vmor %vm164_vm7, %vm165_vm10 }
  0x96   :  { %v157_v17 = vsel %vm1017_vm4, %v740_v3, %v153_v54  ;;  %v173_v21 = vmul.f32 %v1004_v16, %v172_v58  ;;  %v160_v23 = vmul.f32 %v1015_v43, %v159_v61  ;;  %v179_v27 = vmul.f32 %v750_v62, %v1002_v15  ;;  %vm146_vm2 = vmor %vm144_vm11, %vm145_vm13 }
  0x97   :  { %v140_v3 = vmul.f32 %v748_v52, %v139_v9  ;;  %v137_v55 = vsel %vm1049_vm9, %v1000_v10, %v133_v63  ;;  %v290_v53 = vmul.f32 %v157_v17, %v881_v0  ;;  %v1063_v40 = vmax.f32 %v105_v51, 1e-24 }
  0x98   :  { %v161_v29 = vmul.f32 0.5, %v160_v23  ;;  %v180_v31 = vmul.f32 %v750_v62, %v179_v27  ;;  %v177_v34 = vsel %vm1039_vm8, %v1004_v16, %v173_v21  ;;  %vm185_vm14 = vweird.f32 %v750_v62 }
  0x99   :  { %v141_v37 = vmul.f32 0.5, %v140_v3  ;;  %753 = vrsqrt.f32 %v1031_v11  ;;  %v288_v61 = vmul.f32 %v137_v55, %v883_v1  ;;  %v292_v9 = vmul.f32 %v177_v34, %v885_v2  ;;  %vm1087_vm0 = vmor %vm184_vm12, %vm185_vm14 }
  0x9a   :  { %v162_v46 = vsub.f32 1.5, %v161_v29  ;;  %v181_v49 = vmul.f32 0.5, %v180_v31  ;;  %v107_v54 = vpop.xlane.xlu0 %106  ;;  %v97_v58 = vpop.xlane.xlu1 %96  ;;  %755 = vrsqrt.f32 %v1063_v40  ;;  %vm194_vm1 = vweird.f32 %v1023_v50 }
  0x9b   :  { %v1066_v10 = vpop.eup %751  ;;  %v142_v16 = vsub.f32 1.5, %v141_v37  ;;  %v1078_v51 = vmax.f32 %v107_v54, 1e-24  ;;  %v99_v63 = vpop.xlane.xlu2 %98  ;;  %v1093_v23 = vmax.f32 %v97_v58, 1e-24  ;;  %vm204_vm4 = vweird.f32 %v1031_v11 }
  0x9c   :  { %v163_v17 = vmul.f32 %v1015_v43, %v162_v46  ;;  %v182_v21 = vsub.f32 1.5, %v181_v49  ;;  %v189_v1 = vmul.f32 %v1066_v10, %v1023_v50  ;;  %v1102_v28 = vmax.f32 %v99_v63, 1e-24 }
  0x9d   :  { %v143_v22 = vmul.f32 %v748_v52, %v142_v16  ;;  %757 = vrsqrt.f32 %v1078_v51  ;;  %vm195_vm3 = vweird.f32 %v1066_v10  ;;  %vm254_vm5 = vweird.f32 %v1063_v40 }
  0x9e   :  { %v167_v2 = vsel %vm1073_vm15, %v1015_v43, %v163_v17  ;;  %v183_v27 = vmul.f32 %v750_v62, %v182_v21  ;;  %v190_v15 = vmul.f32 %v1066_v10, %v189_v1  ;;  %759 = vrsqrt.f32 %v1093_v23  ;;  %vm1128_vm6 = vmor %vm194_vm1, %vm195_vm3 }
  0x9f   :  { %v291_v3 = vmul.f32 %v167_v2, %v893_v6  ;;  %v147_v55 = vsel %vm146_vm2, %v748_v52, %v143_v22  ;;  %v1107_v29 = vpop.eup %753  ;;  %761 = vrsqrt.f32 %v1102_v28  ;;  %vm264_vm7 = vweird.f32 %v1078_v51 }
  0xa0   :  { %v289_v43 = vmul.f32 %v147_v55, %v895_v7  ;;  %v187_v5 = vsel %vm1087_vm0, %v750_v62, %v183_v27  ;;  %v191_v31 = vmul.f32 0.5, %v190_v15  ;;  %v1113_v34 = vpop.eup %755  ;;  %v199_v52 = vmul.f32 %v1107_v29, %v1031_v11 }
  0xa1   :  { %v671_v37 = vpack.c.bf16 %v291_v3, %v290_v53  ;;  %v293_v6 = vmul.f32 %v187_v5, %v897_v8  ;;  %v249_v7 = vmul.f32 %v1113_v34, %v1063_v40  ;;  %vm255_vm8 = vweird.f32 %v1113_v34 }
  0xa2   :  { %v666_v46 = vpack.c.bf16 %v289_v43, %v288_v61  ;;  %v192_v49 = vsub.f32 1.5, %v191_v31  ;;  %v111_v62 = vpop.xlane.xlu1 %110  ;;  %v109_v54 = vpop.xlane.xlu0 %108  ;;  %v200_v61 = vmul.f32 %v1107_v29, %v199_v52  ;;  %vm205_vm9 = vweird.f32 %v1107_v29  ;;  %vm1172_vm13 = vmor %vm254_vm5, %vm255_vm8 }
  0xa3   :  { %v1122_v58 = vpop.eup %757  ;;  %703 = vst [vmem:[#allocation2] sm:$0xff] %v671_v37   ;;  %v676_v53 = vpack.c.bf16 %v293_v6, %v292_v9  ;;  %v1133_v0 = vmax.f32 %v111_v62, 1e-24  ;;  %v1135_v16 = vmax.f32 %v109_v54, 1e-24  ;;  %v250_v17 = vmul.f32 %v1113_v34, %v249_v7  ;;  %v101_v15 = vpop.xlane.xlu2 %100  ;;  %vm1160_vm12 = vmor %vm204_vm4, %vm205_vm9 }
  0xa4   :  { %667 = vst [vmem:[#allocation2 + $0x30] sm:$0xff] %v666_v46   ;;  %v193_v63 = vmul.f32 %v1066_v10, %v192_v49  ;;  %v259_v9 = vmul.f32 %v1122_v58, %v1078_v51  ;;  %v1142_v50 = vpop.eup %759  ;;  %v201_v21 = vmul.f32 0.5, %v200_v61  ;;  %vm265_vm10 = vweird.f32 %v1122_v58 }
  0xa5   :  { %704 = vst [vmem:[#allocation2 + $0x18] sm:$0xff] %v676_v53   ;;  %763 = vrsqrt.f32 %v1133_v0  ;;  %v1147_v1 = vpop.eup %761  ;;  %v251_v4 = vmul.f32 0.5, %v250_v17  ;;  %v209_v27 = vmul.f32 %v1142_v50, %v1093_v23  ;;  %vm214_vm11 = vweird.f32 %v1093_v23  ;;  %vm1189_vm15 = vmor %vm264_vm7, %vm265_vm10 }
  0xa6   :  { %v197_v22 = vsel %vm1128_vm6, %v1066_v10, %v193_v63  ;;  %v260_v2 = vmul.f32 %v1122_v58, %v259_v9  ;;  %v202_v3 = vsub.f32 1.5, %v201_v21  ;;  %765 = vrsqrt.f32 %v1135_v16 }
  0xa7   :  { %v252_v55 = vsub.f32 1.5, %v251_v4  ;;  %v210_v5 = vmul.f32 %v1142_v50, %v209_v27  ;;  %v219_v31 = vmul.f32 %v1147_v1, %v1102_v28  ;;  %v294_v37 = vmul.f32 %v197_v22, %v905_v12 }
  0xa8   :  { %v261_v10 = vmul.f32 0.5, %v260_v2  ;;  %v203_v11 = vmul.f32 %v1107_v29, %v202_v3  ;;  %vm215_vm14 = vweird.f32 %v1142_v50  ;;  %v1178_v52 = vmax.f32 %v101_v15, 1e-24 }
  0xa9   :  { %v253_v46 = vmul.f32 %v1113_v34, %v252_v55  ;;  %v211_v7 = vmul.f32 0.5, %v210_v5  ;;  %v220_v12 = vmul.f32 %v1147_v1, %v219_v31  ;;  %vm224_vm0 = vweird.f32 %v1102_v28  ;;  %vm1209_vm1 = vmor %vm214_vm11, %vm215_vm14 }
  0xaa   :  { %v262_v49 = vsub.f32 1.5, %v261_v10  ;;  %v103_v62 = vpop.xlane.xlu0 %102  ;;  %v207_v40 = vsel %vm1160_vm12, %v1107_v29, %v203_v11  ;;  %767 = vrsqrt.f32 %v1178_v52  ;;  %vm225_vm2 = vweird.f32 %v1147_v1 }
  0xab   :  { %v764_v54 = vpop.eup %763  ;;  %v1193_v8 = vld [vmem:[#allocation2 + $0x30] sm:$0xff]  ;;  %v1197_v61 = vmax.f32 %v103_v62, 1e-24  ;;  %v257_v29 = vsel %vm1172_vm13, %v1113_v34, %v253_v46  ;;  %v295_v63 = vmul.f32 %v207_v40, %v907_v13  ;;  %v212_v17 = vsub.f32 1.5, %v211_v7  ;;  %vm1229_vm5 = vmor %vm224_vm0, %vm225_vm2 }
  0xac   :  { %v263_v51 = vmul.f32 %v1122_v58, %v262_v49  ;;  %v766_v9 = vpop.eup %765  ;;  %v300_v21 = vmul.f32 %v257_v29, %v909_v14  ;;  %v279_v4 = vmul.f32 %v764_v54, %v1133_v0  ;;  %432 = vmatmul.bf16.vlgmr.msra.gmra.mxu0 %v1193_v8  ;;  %v221_v34 = vmul.f32 0.5, %v220_v12 }
  0xad   :  { %v681_v13 = vpack.c.bf16 %v295_v63, %v294_v37  ;;  %v213_v2 = vmul.f32 %v1142_v50, %v212_v17  ;;  %v269_v23 = vmul.f32 %v766_v9, %v1135_v16  ;;  %vm284_vm3 = vweird.f32 %v1133_v0 }
  0xae   :  { %v267_v14 = vsel %vm1189_vm15, %v1122_v58, %v263_v51  ;;  %v280_v15 = vmul.f32 %v764_v54, %v279_v4  ;;  %v222_v3 = vsub.f32 1.5, %v221_v34  ;;  %vm274_vm4 = vweird.f32 %v1135_v16  ;;  %v1251_v4 = vld [vmem:[#allocation2] sm:$0xff] }
  0xaf   :  { %v301_v27 = vmul.f32 %v267_v14, %v917_v18  ;;  %705 = vst [vmem:[#allocation2 + $0x10] sm:$0xff] %v681_v13   ;;  %v217_v55 = vsel %vm1209_vm1, %v1142_v50, %v213_v2  ;;  %v270_v43 = vmul.f32 %v766_v9, %v269_v23  ;;  %769 = vrsqrt.f32 %v1197_v61 }
  0xb0   :  { %v768_v18 = vpop.eup %767  ;;  %v281_v5 = vmul.f32 0.5, %v280_v15  ;;  %vm285_vm6 = vweird.f32 %v764_v54  ;;  %v223_v31 = vmul.f32 %v1147_v1, %v222_v3  ;;  %v296_v37 = vmul.f32 %v217_v55, %v919_v19 }
  0xb1   :  { %v696_v10 = vpack.c.bf16 %v301_v27, %v300_v21  ;;  %v271_v50 = vmul.f32 0.5, %v270_v43  ;;  %vm275_vm7 = vweird.f32 %v766_v9  ;;  %v229_v6 = vmul.f32 %v768_v18, %v1178_v52  ;;  %vm286_vm8 = vmor %vm284_vm3, %vm285_vm6 }
  0xb2   :  { %v282_v28 = vsub.f32 1.5, %v281_v5  ;;  %v227_v11 = vsel %vm1229_vm5, %v1147_v1, %v223_v31  ;;  %vm276_vm9 = vmor %vm274_vm4, %vm275_vm7  ;;  %vm234_vm10 = vweird.f32 %v1178_v52  ;;  %vm235_vm11 = vweird.f32 %v768_v18 }
  0xb3   :  { %708 = vst [vmem:[#allocation2 + $0x28] sm:$0xff] %v696_v10   ;;  %v272_v46 = vsub.f32 1.5, %v271_v50  ;;  %v297_v49 = vmul.f32 %v227_v11, %v921_v20  ;;  %v230_v7 = vmul.f32 %v768_v18, %v229_v6  ;;  %vm236_vm12 = vmor %vm234_vm10, %vm235_vm11  ;;  %vm244_vm13 = vweird.f32 %v1197_v61 }
  0xb4   :  { %v283_v12 = vmul.f32 %v764_v54, %v282_v28 }
  0xb5   :  { %v770_v19 = vpop.eup %769  ;;  %v273_v62 = vmul.f32 %v766_v9, %v272_v46  ;;  %v686_v40 = vpack.c.bf16 %v297_v49, %v296_v37  ;;  %v231_v53 = vmul.f32 0.5, %v230_v7 }
  0xb6   :  { %v287_v29 = vsel %vm286_vm8, %v764_v54, %v283_v12  ;;  %v239_v1 = vmul.f32 %v770_v19, %v1197_v61  ;;  %vm245_vm14 = vweird.f32 %v770_v19  ;;  %v1260_v61 = vld [vmem:[#allocation2 + $0x18] sm:$0xff]  ;;  %v1264_v23 = vld [vmem:[#allocation2 + $0x10] sm:$0xff] }
  0xb7   :  { %v303_v0 = vmul.f32 %v287_v29, %v929_v24  ;;  %v277_v63 = vsel %vm276_vm9, %v766_v9, %v273_v62  ;;  %706 = vst [vmem:[#allocation2 + $0x8] sm:$0xff] %v686_v40   ;;  %v232_v20 = vsub.f32 1.5, %v231_v53  ;;  %vm246_vm15 = vmor %vm244_vm13, %vm245_vm14 }
  0xb8   :  { %v302_v51 = vmul.f32 %v277_v63, %v931_v25  ;;  %v240_v17 = vmul.f32 %v770_v19, %v239_v1 }
  0xb9   :  { %v233_v21 = vmul.f32 %v768_v18, %v232_v20 }
  0xba   :  { %v1249_v16 = vld [vmem:[#allocation2 + $0x28] sm:$0xff]  ;;  %v701_v22 = vpack.c.bf16 %v303_v0, %v302_v51  ;;  %v241_v54 = vmul.f32 0.5, %v240_v17 }
  0xbb   :  { %462 = vmatmul.bf16.vlgmr.msra.gmra.mxu3 %v1249_v16  ;;  %v237_v24 = vsel %vm236_vm12, %v768_v18, %v233_v21 }
  0xbc   :  { %709 = vst [vmem:[#allocation2 + $0x38] sm:$0xff] %v701_v22   ;;  %437 = vmatmul.bf16.gmra.mxu0 %v1251_v4  ;;  %v242_v52 = vsub.f32 1.5, %v241_v54  ;;  %v298_v9 = vmul.f32 %v237_v24, %v933_v26 }
  0xbe   :  { %v243_v25 = vmul.f32 %v770_v19, %v242_v52  ;;  %v1267_v27 = vld [vmem:[#allocation2 + $0x8] sm:$0xff] }
  0xc0   :  { %v247_v34 = vsel %vm246_vm15, %v770_v19, %v243_v25 }
  0xc1   :  { %v299_v13 = vmul.f32 %v247_v34, %v941_v30 }
  0xc3   :  { %v691_v14 = vpack.c.bf16 %v299_v13, %v298_v9  ;;  %v1258_v2 = vld [vmem:[#allocation2 + $0x38] sm:$0xff] }
  0xc5   :  { %707 = vst [vmem:[#allocation2 + $0x20] sm:$0xff] %v691_v14  }
  0xcb   :  { %467 = vmatmul.bf16.gmra.mxu3 %v1258_v2 }
  0xcc   :  { %442 = vmatmul.bf16.gmra.mxu0 %v1260_v61  ;;  %v1270_v26 = vld [vmem:[#allocation2 + $0x20] sm:$0xff] }
  0xdc   :  { %447 = vmatmul.bf16.gmra.mxu0 %v1264_v23 }
  0xec   :  { %452 = vmatmul.bf16.gmra.mxu0 %v1267_v27 }
  0xfc   :  { %457 = vmatmul.bf16.gmra.mxu0 %v1270_v26 }
 0x129   :  { %v433_v30 = vpop.f32.mrf.mxu0 }
 0x12a   :  { %v434_v3 = vadd.f32 %v433_v30, %v990_v59 }
 0x131   :  { %v435_v15 = vpop.f32.mrf.mxu0 }
 0x132   :  { %v436_v55 = vadd.f32 %v435_v15, %v992_v60 }
 0x134   :  { %v473_v43 = vpack.c.bf16 %v436_v55, %v434_v3 }
 0x139   :  { %v438_v58 = vpop.f32.mrf.mxu0 }
 0x13a   :  { %v439_v5 = vadd.f32 %v438_v58, %v983_v56 }
 0x13e   :  { %v463_v18 = vpop.f32.mrf.mxu3 }
 0x13f   :  { %v464_v12 = vadd.f32 %v463_v18, %v951_v35 }
 0x141   :  { %v440_v10 = vpop.f32.mrf.mxu0 }
 0x142   :  { %v441_v31 = vadd.f32 %v440_v10, %v985_v57 }
 0x144   :  { %v474_v37 = vpack.c.bf16 %v441_v31, %v439_v5 }
 0x146   :  { %v465_v50 = vpop.f32.mrf.mxu3 }
 0x147   :  { %v466_v19 = vadd.f32 %v465_v50, %v953_v36 }
 0x149   :  { %v443_v6 = vpop.f32.mrf.mxu0  ;;  %v479_v53 = vpack.c.bf16 %v466_v19, %v464_v12 }
 0x14a   :  { %v444_v13 = vadd.f32 %v443_v6, %v975_v47 }
 0x14e   :  { %v468_v28 = vpop.f32.mrf.mxu3 }
 0x14f   :  { %v469_v46 = vadd.f32 %v468_v28, %v945_v32 }
 0x151   :  { %v445_v11 = vpop.f32.mrf.mxu0 }
 0x152   :  { %v446_v9 = vadd.f32 %v445_v11, %v977_v48 }
 0x154   :  { %v475_v14 = vpack.c.bf16 %v446_v9, %v444_v13 }
 0x156   :  { %v470_v49 = vpop.f32.mrf.mxu3 }
 0x157   :  { %v471_v7 = vadd.f32 %v470_v49, %v947_v33 }
 0x159   :  { %v448_v62 = vpop.f32.mrf.mxu0  ;;  %v480_v40 = vpack.c.bf16 %v471_v7, %v469_v46 }
 0x15a   :  { %v449_v25 = vadd.f32 %v448_v62, %v969_v44 }
 0x15b   :  { %481 = vmatpush.bf16.msra.mxu1 %v480_v40  ;;  %718 = vmatpush.bf16.msrb.mxu3 %v480_v40 }
 0x15f   :  { %482 = vmatpush.bf16.msra.mxu1 %v479_v53  ;;  %719 = vmatpush.bf16.msrb.mxu3 %v479_v53 }
 0x161   :  { %v450_v29 = vpop.f32.mrf.mxu0 }
 0x162   :  { %v451_v24 = vadd.f32 %v450_v29, %v971_v45 }
 0x164   :  { %v476_v34 = vpack.c.bf16 %v451_v24, %v449_v25 }
 0x169   :  { %v453_v1 = vpop.f32.mrf.mxu0 }
 0x16a   :  { %v454_v54 = vadd.f32 %v453_v1, %v963_v41 }
 0x171   :  { %v455_v0 = vpop.f32.mrf.mxu0 }
 0x172   :  { %v456_v21 = vadd.f32 %v455_v0, %v965_v42 }
 0x174   :  { %v477_v52 = vpack.c.bf16 %v456_v21, %v454_v54 }
 0x179   :  { %v458_v63 = vpop.f32.mrf.mxu0 }
 0x17a   :  { %v459_v51 = vadd.f32 %v458_v63, %v957_v38 }
 0x181   :  { %v460_v20 = vpop.f32.mrf.mxu0 }
 0x182   :  { %v461_v17 = vadd.f32 %v460_v20, %v959_v39 }
 0x184   :  { %v478_v22 = vpack.c.bf16 %v461_v17, %v459_v51 }
 0x186   :  { %483 = vmatpush.bf16.msra.mxu1 %v478_v22  ;;  %720 = vmatpush.bf16.msrb.mxu3 %v478_v22 }
 0x18a   :  { %484 = vmatpush.bf16.msra.mxu1 %v477_v52  ;;  %721 = vmatpush.bf16.msrb.mxu3 %v477_v52 }
 0x18e   :  { %485 = vmatpush.bf16.msra.mxu1 %v476_v34  ;;  %722 = vmatpush.bf16.msrb.mxu3 %v476_v34 }
 0x192   :  { %486 = vmatpush.bf16.msra.mxu1 %v475_v14  ;;  %723 = vmatpush.bf16.msrb.mxu3 %v475_v14 }
 0x196   :  { %487 = vmatpush.bf16.msra.mxu1 %v474_v37  ;;  %724 = vmatpush.bf16.msrb.mxu3 %v474_v37 }
 0x19a   :  { %488 = vmatpush.bf16.msra.mxu1 %v473_v43  ;;  %725 = vmatpush.bf16.msrb.mxu3 %v473_v43 }
 0x19d   :  { %489 = vmatmul.bf16.vlgmr.msra.gmra.mxu1 %v1193_v8  ;;  %519 = vmatmul.bf16.vlgmr.msrb.gmra.mxu3 %v1249_v16 }
 0x1ad   :  { %494 = vmatmul.bf16.gmra.mxu1 %v1251_v4  ;;  %524 = vmatmul.bf16.gmra.mxu3 %v1258_v2 }
 0x1bd   :  { %499 = vmatmul.bf16.gmra.mxu1 %v1260_v61 }
 0x1cd   :  { %504 = vmatmul.bf16.gmra.mxu1 %v1264_v23 }
 0x1dd   :  { %509 = vmatmul.bf16.gmra.mxu1 %v1267_v27 }
 0x1ed   :  { %514 = vmatmul.bf16.gmra.mxu1 %v1270_v26 }
 0x21a   :  { %v490_v30 = vpop.f32.mrf.mxu1 }
 0x21b   :  { %v491_v55 = vadd.f32 %v490_v30, %v990_v59 }
 0x220   :  { %v520_v15 = vpop.f32.mrf.mxu3 }
 0x221   :  { %v521_v19 = vadd.f32 %v520_v15, %v951_v35 }
 0x222   :  { %v492_v3 = vpop.f32.mrf.mxu1 }
 0x223   :  { %v493_v43 = vadd.f32 %v492_v3, %v992_v60 }
 0x225   :  { %v530_v58 = vpack.c.bf16 %v493_v43, %v491_v55 }
 0x228   :  { %v522_v18 = vpop.f32.mrf.mxu3 }
 0x229   :  { %v523_v7 = vadd.f32 %v522_v18, %v953_v36 }
 0x22a   :  { %v495_v10 = vpop.f32.mrf.mxu1 }
 0x22b   :  { %v496_v37 = vadd.f32 %v495_v10, %v983_v56  ;;  %v536_v62 = vpack.c.bf16 %v523_v7, %v521_v19 }
 0x230   :  { %v525_v5 = vpop.f32.mrf.mxu3 }
 0x231   :  { %v526_v11 = vadd.f32 %v525_v5, %v945_v32 }
 0x232   :  { %v497_v31 = vpop.f32.mrf.mxu1 }
 0x233   :  { %v498_v50 = vadd.f32 %v497_v31, %v985_v57 }
 0x235   :  { %v531_v6 = vpack.c.bf16 %v498_v50, %v496_v37 }
 0x238   :  { %v527_v28 = vpop.f32.mrf.mxu3 }
 0x239   :  { %v528_v46 = vadd.f32 %v527_v28, %v947_v33 }
 0x23a   :  { %v500_v49 = vpop.f32.mrf.mxu1 }
 0x23b   :  { %v537_v12 = vpack.c.bf16 %v528_v46, %v526_v11  ;;  %v501_v13 = vadd.f32 %v500_v49, %v975_v47 }
 0x23d   :  { %538 = vmatpush.bf16.msra.mxu2 %v537_v12  ;;  %726 = vmatpush.bf16.msra.mxu3 %v537_v12 }
 0x241   :  { %539 = vmatpush.bf16.msra.mxu2 %v536_v62  ;;  %727 = vmatpush.bf16.msra.mxu3 %v536_v62 }
 0x242   :  { %v502_v40 = vpop.f32.mrf.mxu1 }
 0x243   :  { %v503_v9 = vadd.f32 %v502_v40, %v977_v48 }
 0x245   :  { %v532_v14 = vpack.c.bf16 %v503_v9, %v501_v13 }
 0x24a   :  { %v505_v53 = vpop.f32.mrf.mxu1 }
 0x24b   :  { %v506_v25 = vadd.f32 %v505_v53, %v969_v44 }
 0x252   :  { %v507_v29 = vpop.f32.mrf.mxu1 }
 0x253   :  { %v508_v24 = vadd.f32 %v507_v29, %v971_v45 }
 0x255   :  { %v533_v34 = vpack.c.bf16 %v508_v24, %v506_v25 }
 0x25a   :  { %v510_v1 = vpop.f32.mrf.mxu1 }
 0x25b   :  { %v511_v54 = vadd.f32 %v510_v1, %v963_v41 }
 0x262   :  { %v512_v0 = vpop.f32.mrf.mxu1 }
 0x263   :  { %v513_v21 = vadd.f32 %v512_v0, %v965_v42 }
 0x265   :  { %v534_v52 = vpack.c.bf16 %v513_v21, %v511_v54 }
 0x26a   :  { %v515_v63 = vpop.f32.mrf.mxu1 }
 0x26b   :  { %v516_v51 = vadd.f32 %v515_v63, %v957_v38 }
 0x272   :  { %v517_v20 = vpop.f32.mrf.mxu1 }
 0x273   :  { %v518_v17 = vadd.f32 %v517_v20, %v959_v39 }
 0x275   :  { %v535_v22 = vpack.c.bf16 %v518_v17, %v516_v51 }
 0x277   :  { %540 = vmatpush.bf16.msra.mxu2 %v535_v22  ;;  %728 = vmatpush.bf16.msra.mxu3 %v535_v22 }
 0x27b   :  { %541 = vmatpush.bf16.msra.mxu2 %v534_v52  ;;  %729 = vmatpush.bf16.msra.mxu3 %v534_v52 }
 0x27f   :  { %542 = vmatpush.bf16.msra.mxu2 %v533_v34  ;;  %730 = vmatpush.bf16.msra.mxu3 %v533_v34 }
 0x283   :  { %543 = vmatpush.bf16.msra.mxu2 %v532_v14  ;;  %731 = vmatpush.bf16.msra.mxu3 %v532_v14 }
 0x287   :  { %544 = vmatpush.bf16.msra.mxu2 %v531_v6  ;;  %732 = vmatpush.bf16.msra.mxu3 %v531_v6 }
 0x28b   :  { %545 = vmatpush.bf16.msra.mxu2 %v530_v58  ;;  %733 = vmatpush.bf16.msra.mxu3 %v530_v58 }
 0x28e   :  { %546 = vmatmul.bf16.vlgmr.msra.gmra.mxu2 %v1193_v8  ;;  %576 = vmatmul.bf16.vlgmr.msra.gmra.mxu3 %v1249_v16 }
 0x29e   :  { %551 = vmatmul.bf16.gmra.mxu2 %v1251_v4  ;;  %581 = vmatmul.bf16.gmra.mxu3 %v1258_v2 }
 0x2ae   :  { %556 = vmatmul.bf16.gmra.mxu2 %v1260_v61 }
 0x2be   :  { %561 = vmatmul.bf16.gmra.mxu2 %v1264_v23 }
 0x2ce   :  { %566 = vmatmul.bf16.gmra.mxu2 %v1267_v27 }
 0x2de   :  { %571 = vmatmul.bf16.gmra.mxu2 %v1270_v26 }
 0x311   :  { %v547_v30 = vpop.f32.mrf.mxu2  ;;  %v577_v15 = vpop.f32.mrf.mxu3 }
 0x312   :  { %v548_v3 = vadd.f32 %v547_v30, %v990_v59  ;;  %v578_v8 = vadd.f32 %v577_v15, %v951_v35 }
 0x314   :  { %587 = vst [vmem:[#allocation8] sm:$0xff] %v548_v3 }
 0x315   :  { %599 = vst [vmem:[#allocation8 + $0x60] sm:$0xff] %v578_v8 }
 0x319   :  { %v549_v16 = vpop.f32.mrf.mxu2  ;;  %v579_v4 = vpop.f32.mrf.mxu3 }
 0x31a   :  { %v550_v2 = vadd.f32 %v549_v16, %v992_v60  ;;  %v580_v61 = vadd.f32 %v579_v4, %v953_v36 }
 0x31c   :  { %588 = vst [vmem:[#allocation8 + $0x8] sm:$0xff] %v550_v2 }
 0x31d   :  { %600 = vst [vmem:[#allocation8 + $0x68] sm:$0xff] %v580_v61 }
 0x321   :  { %v552_v23 = vpop.f32.mrf.mxu2  ;;  %v582_v27 = vpop.f32.mrf.mxu3 }
 0x322   :  { %v553_v26 = vadd.f32 %v552_v23, %v983_v56  ;;  %v583_v55 = vadd.f32 %v582_v27, %v945_v32 }
 0x324   :  { %589 = vst [vmem:[#allocation8 + $0x10] sm:$0xff] %v553_v26 }
 0x325   :  { %601 = vst [vmem:[#allocation8 + $0x70] sm:$0xff] %v583_v55 }
 0x329   :  { %v554_v59 = vpop.f32.mrf.mxu2  ;;  %v584_v35 = vpop.f32.mrf.mxu3 }
 0x32a   :  { %v555_v43 = vadd.f32 %v554_v59, %v985_v57  ;;  %v585_v58 = vadd.f32 %v584_v35, %v947_v33 }
 0x32c   :  { %590 = vst [vmem:[#allocation8 + $0x18] sm:$0xff] %v555_v43 }
 0x32d   :  { %602 = vst [vmem:[#allocation8 + $0x78] sm:$0xff] %v585_v58 }
 0x331   :  { %v557_v60 = vpop.f32.mrf.mxu2 }
 0x332   :  { %v558_v36 = vadd.f32 %v557_v60, %v975_v47 }
 0x334   :  { %591 = vst [vmem:[#allocation8 + $0x20] sm:$0xff] %v558_v36 }
 0x339   :  { %v559_v18 = vpop.f32.mrf.mxu2 }
 0x33a   :  { %v560_v10 = vadd.f32 %v559_v18, %v977_v48 }
 0x33c   :  { %592 = vst [vmem:[#allocation8 + $0x28] sm:$0xff] %v560_v10 }
 0x341   :  { %v562_v56 = vpop.f32.mrf.mxu2 }
 0x342   :  { %v563_v32 = vadd.f32 %v562_v56, %v969_v44 }
 0x344   :  { %593 = vst [vmem:[#allocation8 + $0x30] sm:$0xff] %v563_v32 }
 0x349   :  { %v564_v5 = vpop.f32.mrf.mxu2 }
 0x34a   :  { %v565_v31 = vadd.f32 %v564_v5, %v971_v45 }
 0x34c   :  { %594 = vst [vmem:[#allocation8 + $0x38] sm:$0xff] %v565_v31 }
 0x351   :  { %v567_v57 = vpop.f32.mrf.mxu2 }
 0x352   :  { %v568_v33 = vadd.f32 %v567_v57, %v963_v41 }
 0x354   :  { %595 = vst [vmem:[#allocation8 + $0x40] sm:$0xff] %v568_v33 }
 0x359   :  { %v569_v37 = vpop.f32.mrf.mxu2 }
 0x35a   :  { %v570_v47 = vadd.f32 %v569_v37, %v965_v42 }
 0x35c   :  { %596 = vst [vmem:[#allocation8 + $0x48] sm:$0xff] %v570_v47 }
 0x361   :  { %v572_v50 = vpop.f32.mrf.mxu2 }
 0x362   :  { %v573_v48 = vadd.f32 %v572_v50, %v957_v38 }
 0x364   :  { %597 = vst [vmem:[#allocation8 + $0x50] sm:$0xff] %v573_v48 }
 0x369   :  { %v574_v44 = vpop.f32.mrf.mxu2 }
 0x36a   :  { %v575_v45 = vadd.f32 %v574_v44, %v959_v39 }
 0x36c   :  { %598 = vst [vmem:[#allocation8 + $0x58] sm:$0xff] %v575_v45 }
 0x36d   :  { %615 = dma.vmem_to_hbm [thread:$0]  %s608_s1, 2048, %s610_s23, [#allocation5], %s850_s17, %s850_s17, %s851_s18  }
 0x36e   :  { %847 = dma.done.wait [#allocation5], 2048  }
 0x36f   :  { %848 = vsyncadd [#allocation5], 4294965248 }
 0x370   :  { %620 = vsyncpa [#allocation4], 1 }
 0x371   :  { %621 = vsyncpa [#allocation7], 1 }
 0x372   :  { %622 = vsyncpa [#allocation5], 1 }

</bundles_post_ra>
